<compile_context>
chip_gen: v6e
topology: v6e:2x2x1
jax: 0.10.0
libtpu: 0.0.40
codegen_flags: <defaults>
</compile_context>

<pallas_src>
import functools

import jax
import jax.numpy as jnp
from jax.experimental import pallas as pl
from jax.experimental.pallas import tpu as pltpu

LANE = 128

# (kind, name, activation) — forward order of the original nn.Module.
LAYERS = (
    ("gcn", "enc_g1", "relu"),
    ("gcn", "enc_g2", "relu"),
    ("gcn", "enc_g3", "relu"),
    ("gcn", "enc_g4", "relu"),
    ("lin", "enc_l1", "relu"),
    ("lin", "enc_l2", "none"),
    ("lin", "dec_l1", "relu"),
    ("lin", "dec_l2", "relu"),
    ("gcn", "dec_g1", "relu"),
    ("gcn", "dec_g2", "relu"),
    ("gcn", "dec_g3", "relu"),
    ("gcn", "dec_g4", "tanh"),
)


def layer_dims(in_channels):
    return {
        # encoder
        "enc_g1": (in_channels, 160), "enc_g2": (160, 80),
        "enc_g3": (80, 40), "enc_g4": (40, 20),
        "enc_l1": (20, 10), "enc_l2": (10, 3),
        # decoder
        "dec_l1": (3, 10), "dec_l2": (10, 20),
        "dec_g1": (20, 40), "dec_g2": (40, 80),
        "dec_g3": (80, 160), "dec_g4": (160, 3),
    }


def _round_up(x, m):
    return ((x + m - 1) // m) * m


def build_plan(in_channels):
    """Static per-layer plan: (kind, act, row_offset, padded_fin, padded_fout)."""
    dims = layer_dims(in_channels)
    plan, row_off = [], 0
    for kind, name, act in LAYERS:
        fi, fo = dims[name]
        fpi, fpo = _round_up(fi, LANE), _round_up(fo, LANE)
        plan.append((kind, act, row_off, fpi, fpo))
        row_off += fpi
    max_cols = max(p[4] for p in plan)
    return tuple(plan), row_off, max_cols


# ------------------------- fused Pallas kernel ------------------------------

def _gccn_fused_kernel(a_ref, x_ref, w_ref, b_ref, o_ref, *, plan):
    """All 12 layers unrolled at trace time; intermediates never touch HBM.

    a_ref: (N, N) normalized adjacency, loaded once, reused by all GCN layers.
    x_ref: (N, 128) lane-padded node features.
    w_ref: (sum_padded_fin, 256) packed zero-padded weight slab.
    b_ref: (12, 256) packed zero-padded bias slab.
    o_ref: (N, 128) lane-dense padded output (real data in the first 3 lanes).
    """
    a = a_ref[...]
    h = x_ref[...]
    b_all = b_ref[...]

    for idx, (kind, act, row_off, fpi, fpo) in enumerate(plan):
        # Static, 128-aligned slab slices (offsets are Python ints).
        w = w_ref[row_off:row_off + fpi, :fpo]
        b = b_all[idx:idx + 1, :fpo]

        if kind == "gcn":
            if fpi < fpo:
                # Padded input width smaller -> contract the N x N propagation
                # over the narrower feature dim: (A @ H) @ W.
                ah = jnp.dot(a, h, preferred_element_type=jnp.float32)
                h = jnp.dot(ah, w, preferred_element_type=jnp.float32)
            else:
                # Reference order A @ (H @ W) (also when padded widths equal).
                hw = jnp.dot(h, w, preferred_element_type=jnp.float32)
                h = jnp.dot(a, hw, preferred_element_type=jnp.float32)
        else:  # linear
            h = jnp.dot(h, w, preferred_element_type=jnp.float32)

        h = h + b
        if act == "relu":
            h = jnp.maximum(h, 0.0)
        elif act == "tanh":
            h = jnp.tanh(h)

    o_ref[...] = h.astype(o_ref.dtype)


# ------------------------- packing + wrapper ---------------------------------

def pack_params(params, in_channels):
    """Zero-pad each W to (padded_fin, 256) and stack into one slab; biases into (12, 256)."""
    dims = layer_dims(in_channels)
    plan, _, max_cols = build_plan(in_channels)
    w_blocks, b_rows = [], []
    for (kind, name, act), (_, _, _, fpi, fpo) in zip(LAYERS, plan):
        fi, fo = dims[name]
        w = params[name + "_w"].astype(jnp.float32)
        b = params[name + "_b"].astype(jnp.float32).reshape(-1)
        w_blocks.append(
            jnp.zeros((fpi, max_cols), jnp.float32).at[:fi, :fo].set(w))
        b_rows.append(
            jnp.zeros((max_cols,), jnp.float32).at[:fo].set(b))
    return jnp.concatenate(w_blocks, axis=0), jnp.stack(b_rows, axis=0)


def _pick_vmem_limit():
    """Derive the scoped-VMEM limit from the actual chip instead of hard-coding."""
    try:
        cap = int(getattr(pltpu.get_tpu_info(), "vmem_capacity_bytes", 64 << 20))
    except Exception:
        cap = 64 << 20
    return int(min(max(cap // 2, 16 << 20), 64 << 20))


def gccn_forward(x, a_hat, params):
    """Single fused pallas_call over the whole autoencoder."""
    n, c = x.shape
    plan, _, _ = build_plan(c)
    w_slab, b_slab = pack_params(params, c)

    c_pad = _round_up(c, LANE)
    xp = jnp.zeros((n, c_pad), jnp.float32).at[:, :c].set(x.astype(jnp.float32))

    fp_out_final = plan[-1][4]               # 128 (lane-dense output width)
    fo_final = layer_dims(c)["dec_g4"][1]    # 3 (real output width)

    kernel = functools.partial(_gccn_fused_kernel, plan=plan)
    out_padded = pl.pallas_call(
        kernel,
        out_shape=jax.ShapeDtypeStruct((n, fp_out_final), jnp.float32),
        in_specs=[
            pl.BlockSpec(a_hat.shape, lambda: (0, 0)),
            pl.BlockSpec(xp.shape, lambda: (0, 0)),
            pl.BlockSpec(w_slab.shape, lambda: (0, 0)),
            pl.BlockSpec(b_slab.shape, lambda: (0, 0)),
        ],
        out_specs=pl.BlockSpec((n, fp_out_final), lambda: (0, 0)),
        compiler_params=pltpu.CompilerParams(
            vmem_limit_bytes=_pick_vmem_limit()),
    )(a_hat.astype(jnp.float32), xp, w_slab, b_slab)

    # Lane-dense store inside the kernel; trim the 3 real columns outside.
    return out_padded[:, :fo_final]


# ---------------------------- glue (plain JAX) -------------------------------

def build_normalized_adj(edge_index, num_nodes):
    """Dense A_hat = D^{-1/2} (A + I) D^{-1/2}  (PyG gcn_norm, symmetric)."""
    src, dst = edge_index
    a = jnp.zeros((num_nodes, num_nodes), jnp.float32)
    a = a.at[dst, src].set(1.0)                      # message j -> i at A[i, j]
    a = a + jnp.eye(num_nodes, dtype=jnp.float32)    # self-loops BEFORE degree
    deg = a.sum(axis=1)
    d_inv_sqrt = 1.0 / jnp.sqrt(deg)
    return a * d_inv_sqrt[:, None] * d_inv_sqrt[None, :]


def init_params(key, in_channels):
    params = {}
    for name, (fi, fo) in layer_dims(in_channels).items():
        key, kw, kb = jax.random.split(key, 3)
        scale = 1.0 / jnp.sqrt(jnp.float32(fi))
        params[name + "_w"] = jax.random.uniform(
            kw, (fi, fo), jnp.float32, -scale, scale)
        params[name + "_b"] = jax.random.uniform(
            kb, (1, fo), jnp.float32, -scale, scale)
    return params


def gccn_reference(x, a_hat, params):
    """Pure-JAX reference (same math, canonical association)."""
    h = x
    for kind, name, act in LAYERS:
        w = params[name + "_w"]
        b = params[name + "_b"]
        if kind == "gcn":
            h = a_hat @ (h @ w) + b
        else:
            h = h @ w + b
        if act == "relu":
            h = jnp.maximum(h, 0.0)
        elif act == "tanh":
            h = jnp.tanh(h)
    return h


# ---------------------------------- main -------------------------------------

if __name__ == "__main__":
    key = jax.random.PRNGKey(0)
    num_nodes = 16
    in_channels = 4

    # Node features (batch.x): [N, in_channels]
    key, kx = jax.random.split(key)
    x = jax.random.normal(kx, (num_nodes, in_channels), jnp.float32)

    # edge_index: [2, E] — undirected ring graph i <-> (i+1) mod N
    src = jnp.arange(num_nodes, dtype=jnp.int32)
    dst = (src + 1) % num_nodes
    edge_index = jnp.stack(
        [jnp.concatenate([src, dst]), jnp.concatenate([dst, src])], axis=0)

    a_hat = build_normalized_adj(edge_index, num_nodes)
    params = init_params(key, in_channels)

    out = jax.jit(gccn_forward)(x, a_hat, params)
    out = jax.block_until_ready(out)

    # Correctness vs. plain-JAX reference.
    ref = jax.jit(gccn_reference)(x, a_hat, params)
    ref = jax.block_until_ready(ref)

    assert out.shape == (num_nodes, 3), out.shape
    assert bool(jnp.all(jnp.isfinite(out)))
    assert bool(jnp.all(jnp.abs(out) <= 1.0))          # tanh output range
    assert bool(jnp.allclose(out, ref, atol=1e-4, rtol=1e-4))
    print("KERNEL_OK")
</pallas_src>

<mosaic_0001>
module attributes {stable_mosaic.version = 11 : i64} {
  func.func @_gccn_fused_kernel(%arg0: memref<16x16xf32, #tpu.memory_space<vmem>>, %arg1: memref<16x128xf32, #tpu.memory_space<vmem>>, %arg2: memref<1792x256xf32, #tpu.memory_space<vmem>>, %arg3: memref<12x256xf32, #tpu.memory_space<vmem>>, %arg4: memref<16x128xf32, #tpu.memory_space<vmem>>) attributes {dimension_semantics = [], scalar_prefetch = 0 : i64, scratch_operands = 0 : i64, tpu.core_type = #tpu.core_type<tc>} {
    %c0 = arith.constant 0 : index
    %c0_0 = arith.constant 0 : index
    %0 = vector.load %arg0[%c0, %c0_0] : memref<16x16xf32, #tpu.memory_space<vmem>>, vector<16x16xf32>
    %c0_1 = arith.constant 0 : index
    %c0_2 = arith.constant 0 : index
    %1 = vector.load %arg1[%c0_1, %c0_2] : memref<16x128xf32, #tpu.memory_space<vmem>>, vector<16x128xf32>
    %c0_3 = arith.constant 0 : index
    %c0_4 = arith.constant 0 : index
    %2 = vector.load %arg3[%c0_3, %c0_4] : memref<12x256xf32, #tpu.memory_space<vmem>>, vector<12x256xf32>
    %c0_5 = arith.constant 0 : index
    %c0_6 = arith.constant 0 : index
    %3 = vector.load %arg2[%c0_5, %c0_6] : memref<1792x256xf32, #tpu.memory_space<vmem>>, vector<128x256xf32>
    %4 = vector.extract_strided_slice %2 {offsets = [0, 0], sizes = [1, 256], strides = [1, 1]} : vector<12x256xf32> to vector<1x256xf32>
    %cst = arith.constant dense<0.000000e+00> : vector<16x128xf32>
    %5 = tpu.matmul %0, %1, %cst {dimension_numbers = #tpu.dot_dimension_numbers<[1], [0], [0], [1], [0, 0, 1, 1], [], []>} : vector<16x16xf32>, vector<16x128xf32>, vector<16x128xf32> -> vector<16x128xf32>
    %cst_7 = arith.constant dense<0.000000e+00> : vector<16x256xf32>
    %6 = tpu.matmul %5, %3, %cst_7 {dimension_numbers = #tpu.dot_dimension_numbers<[1], [0], [0], [1], [0, 0, 1, 1], [], []>} : vector<16x128xf32>, vector<128x256xf32>, vector<16x256xf32> -> vector<16x256xf32>
    %7 = vector.broadcast %4 : vector<1x256xf32> to vector<16x256xf32>
    %8 = arith.addf %6, %7 : vector<16x256xf32>
    %cst_8 = arith.constant 0.000000e+00 : f32
    %9 = vector.broadcast %cst_8 : f32 to vector<16x256xf32>
    %10 = arith.maximumf %8, %9 : vector<16x256xf32>
    %c128 = arith.constant 128 : index
    %c0_9 = arith.constant 0 : index
    %11 = vector.load %arg2[%c128, %c0_9] : memref<1792x256xf32, #tpu.memory_space<vmem>>, vector<256x128xf32>
    %12 = vector.extract_strided_slice %2 {offsets = [1, 0], sizes = [1, 128], strides = [1, 1]} : vector<12x256xf32> to vector<1x128xf32>
    %cst_10 = arith.constant dense<0.000000e+00> : vector<16x128xf32>
    %13 = tpu.matmul %10, %11, %cst_10 {dimension_numbers = #tpu.dot_dimension_numbers<[1], [0], [0], [1], [0, 0, 1, 1], [], []>} : vector<16x256xf32>, vector<256x128xf32>, vector<16x128xf32> -> vector<16x128xf32>
    %cst_11 = arith.constant dense<0.000000e+00> : vector<16x128xf32>
    %14 = tpu.matmul %0, %13, %cst_11 {dimension_numbers = #tpu.dot_dimension_numbers<[1], [0], [0], [1], [0, 0, 1, 1], [], []>} : vector<16x16xf32>, vector<16x128xf32>, vector<16x128xf32> -> vector<16x128xf32>
    %15 = vector.broadcast %12 : vector<1x128xf32> to vector<16x128xf32>
    %16 = arith.addf %14, %15 : vector<16x128xf32>
    %cst_12 = arith.constant 0.000000e+00 : f32
    %17 = vector.broadcast %cst_12 : f32 to vector<16x128xf32>
    %18 = arith.maximumf %16, %17 : vector<16x128xf32>
    %c384 = arith.constant 384 : index
    %c0_13 = arith.constant 0 : index
    %19 = vector.load %arg2[%c384, %c0_13] : memref<1792x256xf32, #tpu.memory_space<vmem>>, vector<128x128xf32>
    %20 = vector.extract_strided_slice %2 {offsets = [2, 0], sizes = [1, 128], strides = [1, 1]} : vector<12x256xf32> to vector<1x128xf32>
    %cst_14 = arith.constant dense<0.000000e+00> : vector<16x128xf32>
    %21 = tpu.matmul %18, %19, %cst_14 {dimension_numbers = #tpu.dot_dimension_numbers<[1], [0], [0], [1], [0, 0, 1, 1], [], []>} : vector<16x128xf32>, vector<128x128xf32>, vector<16x128xf32> -> vector<16x128xf32>
    %cst_15 = arith.constant dense<0.000000e+00> : vector<16x128xf32>
    %22 = tpu.matmul %0, %21, %cst_15 {dimension_numbers = #tpu.dot_dimension_numbers<[1], [0], [0], [1], [0, 0, 1, 1], [], []>} : vector<16x16xf32>, vector<16x128xf32>, vector<16x128xf32> -> vector<16x128xf32>
    %23 = vector.broadcast %20 : vector<1x128xf32> to vector<16x128xf32>
    %24 = arith.addf %22, %23 : vector<16x128xf32>
    %cst_16 = arith.constant 0.000000e+00 : f32
    %25 = vector.broadcast %cst_16 : f32 to vector<16x128xf32>
    %26 = arith.maximumf %24, %25 : vector<16x128xf32>
    %c512 = arith.constant 512 : index
    %c0_17 = arith.constant 0 : index
    %27 = vector.load %arg2[%c512, %c0_17] : memref<1792x256xf32, #tpu.memory_space<vmem>>, vector<128x128xf32>
    %28 = vector.extract_strided_slice %2 {offsets = [3, 0], sizes = [1, 128], strides = [1, 1]} : vector<12x256xf32> to vector<1x128xf32>
    %cst_18 = arith.constant dense<0.000000e+00> : vector<16x128xf32>
    %29 = tpu.matmul %26, %27, %cst_18 {dimension_numbers = #tpu.dot_dimension_numbers<[1], [0], [0], [1], [0, 0, 1, 1], [], []>} : vector<16x128xf32>, vector<128x128xf32>, vector<16x128xf32> -> vector<16x128xf32>
    %cst_19 = arith.constant dense<0.000000e+00> : vector<16x128xf32>
    %30 = tpu.matmul %0, %29, %cst_19 {dimension_numbers = #tpu.dot_dimension_numbers<[1], [0], [0], [1], [0, 0, 1, 1], [], []>} : vector<16x16xf32>, vector<16x128xf32>, vector<16x128xf32> -> vector<16x128xf32>
    %31 = vector.broadcast %28 : vector<1x128xf32> to vector<16x128xf32>
    %32 = arith.addf %30, %31 : vector<16x128xf32>
    %cst_20 = arith.constant 0.000000e+00 : f32
    %33 = vector.broadcast %cst_20 : f32 to vector<16x128xf32>
    %34 = arith.maximumf %32, %33 : vector<16x128xf32>
    %c640 = arith.constant 640 : index
    %c0_21 = arith.constant 0 : index
    %35 = vector.load %arg2[%c640, %c0_21] : memref<1792x256xf32, #tpu.memory_space<vmem>>, vector<128x128xf32>
    %36 = vector.extract_strided_slice %2 {offsets = [4, 0], sizes = [1, 128], strides = [1, 1]} : vector<12x256xf32> to vector<1x128xf32>
    %cst_22 = arith.constant dense<0.000000e+00> : vector<16x128xf32>
    %37 = tpu.matmul %34, %35, %cst_22 {dimension_numbers = #tpu.dot_dimension_numbers<[1], [0], [0], [1], [0, 0, 1, 1], [], []>} : vector<16x128xf32>, vector<128x128xf32>, vector<16x128xf32> -> vector<16x128xf32>
    %38 = vector.broadcast %36 : vector<1x128xf32> to vector<16x128xf32>
    %39 = arith.addf %37, %38 : vector<16x128xf32>
    %cst_23 = arith.constant 0.000000e+00 : f32
    %40 = vector.broadcast %cst_23 : f32 to vector<16x128xf32>
    %41 = arith.maximumf %39, %40 : vector<16x128xf32>
    %c768 = arith.constant 768 : index
    %c0_24 = arith.constant 0 : index
    %42 = vector.load %arg2[%c768, %c0_24] : memref<1792x256xf32, #tpu.memory_space<vmem>>, vector<128x128xf32>
    %43 = vector.extract_strided_slice %2 {offsets = [5, 0], sizes = [1, 128], strides = [1, 1]} : vector<12x256xf32> to vector<1x128xf32>
    %cst_25 = arith.constant dense<0.000000e+00> : vector<16x128xf32>
    %44 = tpu.matmul %41, %42, %cst_25 {dimension_numbers = #tpu.dot_dimension_numbers<[1], [0], [0], [1], [0, 0, 1, 1], [], []>} : vector<16x128xf32>, vector<128x128xf32>, vector<16x128xf32> -> vector<16x128xf32>
    %45 = vector.broadcast %43 : vector<1x128xf32> to vector<16x128xf32>
    %46 = arith.addf %44, %45 : vector<16x128xf32>
    %c896 = arith.constant 896 : index
    %c0_26 = arith.constant 0 : index
    %47 = vector.load %arg2[%c896, %c0_26] : memref<1792x256xf32, #tpu.memory_space<vmem>>, vector<128x128xf32>
    %48 = vector.extract_strided_slice %2 {offsets = [6, 0], sizes = [1, 128], strides = [1, 1]} : vector<12x256xf32> to vector<1x128xf32>
    %cst_27 = arith.constant dense<0.000000e+00> : vector<16x128xf32>
    %49 = tpu.matmul %46, %47, %cst_27 {dimension_numbers = #tpu.dot_dimension_numbers<[1], [0], [0], [1], [0, 0, 1, 1], [], []>} : vector<16x128xf32>, vector<128x128xf32>, vector<16x128xf32> -> vector<16x128xf32>
    %50 = vector.broadcast %48 : vector<1x128xf32> to vector<16x128xf32>
    %51 = arith.addf %49, %50 : vector<16x128xf32>
    %cst_28 = arith.constant 0.000000e+00 : f32
    %52 = vector.broadcast %cst_28 : f32 to vector<16x128xf32>
    %53 = arith.maximumf %51, %52 : vector<16x128xf32>
    %c1024 = arith.constant 1024 : index
    %c0_29 = arith.constant 0 : index
    %54 = vector.load %arg2[%c1024, %c0_29] : memref<1792x256xf32, #tpu.memory_space<vmem>>, vector<128x128xf32>
    %55 = vector.extract_strided_slice %2 {offsets = [7, 0], sizes = [1, 128], strides = [1, 1]} : vector<12x256xf32> to vector<1x128xf32>
    %cst_30 = arith.constant dense<0.000000e+00> : vector<16x128xf32>
    %56 = tpu.matmul %53, %54, %cst_30 {dimension_numbers = #tpu.dot_dimension_numbers<[1], [0], [0], [1], [0, 0, 1, 1], [], []>} : vector<16x128xf32>, vector<128x128xf32>, vector<16x128xf32> -> vector<16x128xf32>
    %57 = vector.broadcast %55 : vector<1x128xf32> to vector<16x128xf32>
    %58 = arith.addf %56, %57 : vector<16x128xf32>
    %cst_31 = arith.constant 0.000000e+00 : f32
    %59 = vector.broadcast %cst_31 : f32 to vector<16x128xf32>
    %60 = arith.maximumf %58, %59 : vector<16x128xf32>
    %c1152 = arith.constant 1152 : index
    %c0_32 = arith.constant 0 : index
    %61 = vector.load %arg2[%c1152, %c0_32] : memref<1792x256xf32, #tpu.memory_space<vmem>>, vector<128x128xf32>
    %62 = vector.extract_strided_slice %2 {offsets = [8, 0], sizes = [1, 128], strides = [1, 1]} : vector<12x256xf32> to vector<1x128xf32>
    %cst_33 = arith.constant dense<0.000000e+00> : vector<16x128xf32>
    %63 = tpu.matmul %60, %61, %cst_33 {dimension_numbers = #tpu.dot_dimension_numbers<[1], [0], [0], [1], [0, 0, 1, 1], [], []>} : vector<16x128xf32>, vector<128x128xf32>, vector<16x128xf32> -> vector<16x128xf32>
    %cst_34 = arith.constant dense<0.000000e+00> : vector<16x128xf32>
    %64 = tpu.matmul %0, %63, %cst_34 {dimension_numbers = #tpu.dot_dimension_numbers<[1], [0], [0], [1], [0, 0, 1, 1], [], []>} : vector<16x16xf32>, vector<16x128xf32>, vector<16x128xf32> -> vector<16x128xf32>
    %65 = vector.broadcast %62 : vector<1x128xf32> to vector<16x128xf32>
    %66 = arith.addf %64, %65 : vector<16x128xf32>
    %cst_35 = arith.constant 0.000000e+00 : f32
    %67 = vector.broadcast %cst_35 : f32 to vector<16x128xf32>
    %68 = arith.maximumf %66, %67 : vector<16x128xf32>
    %c1280 = arith.constant 1280 : index
    %c0_36 = arith.constant 0 : index
    %69 = vector.load %arg2[%c1280, %c0_36] : memref<1792x256xf32, #tpu.memory_space<vmem>>, vector<128x128xf32>
    %70 = vector.extract_strided_slice %2 {offsets = [9, 0], sizes = [1, 128], strides = [1, 1]} : vector<12x256xf32> to vector<1x128xf32>
    %cst_37 = arith.constant dense<0.000000e+00> : vector<16x128xf32>
    %71 = tpu.matmul %68, %69, %cst_37 {dimension_numbers = #tpu.dot_dimension_numbers<[1], [0], [0], [1], [0, 0, 1, 1], [], []>} : vector<16x128xf32>, vector<128x128xf32>, vector<16x128xf32> -> vector<16x128xf32>
    %cst_38 = arith.constant dense<0.000000e+00> : vector<16x128xf32>
    %72 = tpu.matmul %0, %71, %cst_38 {dimension_numbers = #tpu.dot_dimension_numbers<[1], [0], [0], [1], [0, 0, 1, 1], [], []>} : vector<16x16xf32>, vector<16x128xf32>, vector<16x128xf32> -> vector<16x128xf32>
    %73 = vector.broadcast %70 : vector<1x128xf32> to vector<16x128xf32>
    %74 = arith.addf %72, %73 : vector<16x128xf32>
    %cst_39 = arith.constant 0.000000e+00 : f32
    %75 = vector.broadcast %cst_39 : f32 to vector<16x128xf32>
    %76 = arith.maximumf %74, %75 : vector<16x128xf32>
    %c1408 = arith.constant 1408 : index
    %c0_40 = arith.constant 0 : index
    %77 = vector.load %arg2[%c1408, %c0_40] : memref<1792x256xf32, #tpu.memory_space<vmem>>, vector<128x256xf32>
    %78 = vector.extract_strided_slice %2 {offsets = [10, 0], sizes = [1, 256], strides = [1, 1]} : vector<12x256xf32> to vector<1x256xf32>
    %cst_41 = arith.constant dense<0.000000e+00> : vector<16x128xf32>
    %79 = tpu.matmul %0, %76, %cst_41 {dimension_numbers = #tpu.dot_dimension_numbers<[1], [0], [0], [1], [0, 0, 1, 1], [], []>} : vector<16x16xf32>, vector<16x128xf32>, vector<16x128xf32> -> vector<16x128xf32>
    %cst_42 = arith.constant dense<0.000000e+00> : vector<16x256xf32>
    %80 = tpu.matmul %79, %77, %cst_42 {dimension_numbers = #tpu.dot_dimension_numbers<[1], [0], [0], [1], [0, 0, 1, 1], [], []>} : vector<16x128xf32>, vector<128x256xf32>, vector<16x256xf32> -> vector<16x256xf32>
    %81 = vector.broadcast %78 : vector<1x256xf32> to vector<16x256xf32>
    %82 = arith.addf %80, %81 : vector<16x256xf32>
    %cst_43 = arith.constant 0.000000e+00 : f32
    %83 = vector.broadcast %cst_43 : f32 to vector<16x256xf32>
    %84 = arith.maximumf %82, %83 : vector<16x256xf32>
    %c1536 = arith.constant 1536 : index
    %c0_44 = arith.constant 0 : index
    %85 = vector.load %arg2[%c1536, %c0_44] : memref<1792x256xf32, #tpu.memory_space<vmem>>, vector<256x128xf32>
    %86 = vector.extract_strided_slice %2 {offsets = [11, 0], sizes = [1, 128], strides = [1, 1]} : vector<12x256xf32> to vector<1x128xf32>
    %cst_45 = arith.constant dense<0.000000e+00> : vector<16x128xf32>
    %87 = tpu.matmul %84, %85, %cst_45 {dimension_numbers = #tpu.dot_dimension_numbers<[1], [0], [0], [1], [0, 0, 1, 1], [], []>} : vector<16x256xf32>, vector<256x128xf32>, vector<16x128xf32> -> vector<16x128xf32>
    %cst_46 = arith.constant dense<0.000000e+00> : vector<16x128xf32>
    %88 = tpu.matmul %0, %87, %cst_46 {dimension_numbers = #tpu.dot_dimension_numbers<[1], [0], [0], [1], [0, 0, 1, 1], [], []>} : vector<16x16xf32>, vector<16x128xf32>, vector<16x128xf32> -> vector<16x128xf32>
    %89 = vector.broadcast %86 : vector<1x128xf32> to vector<16x128xf32>
    %90 = arith.addf %88, %89 : vector<16x128xf32>
    %91 = math.tanh %90 : vector<16x128xf32>
    %c0_47 = arith.constant 0 : index
    %c0_48 = arith.constant 0 : index
    %92 = vector.load %arg4[%c0_47, %c0_48] : memref<16x128xf32, #tpu.memory_space<vmem>>, vector<16x128xf32>
    tpu.vector_store %arg4[%c0_47, %c0_48], %91 {strides = array<i32>} : memref<16x128xf32, #tpu.memory_space<vmem>>, vector<16x128xf32>,
    return
  }
}

</mosaic_0001>

<bundles_post_ra>
// kernel: gccn_forward.1
= control target key start
LH: loop header
LB: loop body
LE: loop exit
PB: predicated region body
PF: predicated region fallthrough
CT: control target
= control target key end

     0   :  { %vm57_vm0 = vcmask 130048   ;;  %v2491_v36 = vmov 0.0   ;;  %s3409_s1 = inlined_call_operand.vmem [shape: f32[16,128], index: 1, kind: input, shape index: {}]   ;;  %s3410_s0 = inlined_call_operand.vmem [shape: f32[16,16], index: 0, kind: input, shape index: {}]   ;;  %s3411_s2 = inlined_call_operand.vmem [shape: f32[1792,256], index: 2, kind: input, shape index: {}]   ;;  %s3412_s3 = inlined_call_operand.vmem [shape: f32[12,256], index: 3, kind: input, shape index: {}]   ;;  %s3413_s4 = inlined_call_operand.vmem [shape: f32[16,128], index: 4, kind: output, shape index: {}]  }
   0x1   :  { %v20_v0 = vld [vmem:[%s3409_s1 + $0x8] sm:$0xff]  ;;  %v19_v1 = vld [vmem:[%s3409_s1] sm:$0xff]  ;;  %v56_v3 = vld [vmem:[%s3411_s2 + $0xf8] sm:$0xff]  ;;  %211 = vmatprep.mubr.f32.mxu1 %v2491_v36 }
   0x2   :  { %v2526_v2 = vld [vmem:[%s3410_s0] sm:$0xff]  ;;  %2148 = vmatprep.subr.mxu0 %v20_v0  ;;  %v55_v4 = vld [vmem:[%s3411_s2 + $0xf0] sm:$0xff]  ;;  %v2539_v5 = vld [vmem:[%s3410_s0 + $0x8] sm:$0xff]  ;;  %147 = vmatprep.subr.mxu1 %v56_v3 }
   0x3   :  { %2152 = vmatprep.mubr.msk.f32.mxu0 %vm57_vm0, %v2526_v2  ;;  %2149 = vmatpush3.msra.mxu0 %v20_v0  ;;  %v54_v6 = vld [vmem:[%s3411_s2 + $0xe8] sm:$0xff]  ;;  %v53_v7 = vld [vmem:[%s3411_s2 + $0xe0] sm:$0xff]  ;;  %v52_v8 = vld [vmem:[%s3411_s2 + $0xd8] sm:$0xff] }
   0x4   :  { %2150 = vmatprep.subr.mxu0 %v19_v1  ;;  %148 = vmatpush1.msra.mxu1 %v55_v4  ;;  %v51_v9 = vld [vmem:[%s3411_s2 + $0xd0] sm:$0xff]  ;;  %v50_v10 = vld [vmem:[%s3411_s2 + $0xc8] sm:$0xff]  ;;  %v49_v11 = vld [vmem:[%s3411_s2 + $0xc0] sm:$0xff] }
   0x5   :  { %2151 = vmatpush3.msra.mxu0 %v19_v1  ;;  %149 = vmatprep.subr.mxu1 %v54_v6  ;;  %v48_v12 = vld [vmem:[%s3411_s2 + $0xb8] sm:$0xff]  ;;  %v47_v13 = vld [vmem:[%s3411_s2 + $0xb0] sm:$0xff]  ;;  %v46_v14 = vld [vmem:[%s3411_s2 + $0xa8] sm:$0xff] }
   0x6   :  { %2153 = vmatmul.mubr.msk.f32.vlgmr.msra.gmra.mxu0 %vm57_vm0, %v2539_v5  ;;  %150 = vmatpush1.msra.mxu1 %v53_v7  ;;  %v45_v15 = vld [vmem:[%s3411_s2 + $0xa0] sm:$0xff]  ;;  %v44_v16 = vld [vmem:[%s3411_s2 + $0x98] sm:$0xff]  ;;  %v43_v17 = vld [vmem:[%s3411_s2 + $0x90] sm:$0xff] }
   0x7   :  { %151 = vmatprep.subr.mxu1 %v52_v8  ;;  %v42_v18 = vld [vmem:[%s3411_s2 + $0x88] sm:$0xff]  ;;  %v41_v19 = vld [vmem:[%s3411_s2 + $0x80] sm:$0xff]  ;;  %v40_v20 = vld [vmem:[%s3411_s2 + $0x78] sm:$0xff] }
   0x8   :  { %152 = vmatpush1.msra.mxu1 %v51_v9  ;;  %v39_v21 = vld [vmem:[%s3411_s2 + $0x70] sm:$0xff]  ;;  %v38_v22 = vld [vmem:[%s3411_s2 + $0x68] sm:$0xff]  ;;  %v37_v23 = vld [vmem:[%s3411_s2 + $0x60] sm:$0xff]  ;;  %v139_v9 = vlaneseq }
   0x9   :  { %153 = vmatprep.subr.mxu1 %v50_v10  ;;  %v36_v24 = vld [vmem:[%s3411_s2 + $0x58] sm:$0xff]  ;;  %v35_v25 = vld [vmem:[%s3411_s2 + $0x50] sm:$0xff]  ;;  %v34_v26 = vld [vmem:[%s3411_s2 + $0x48] sm:$0xff] }
   0xa   :  { %154 = vmatpush1.msra.mxu1 %v49_v11  ;;  %v33_v27 = vld [vmem:[%s3411_s2 + $0x40] sm:$0xff]  ;;  %v32_v28 = vld [vmem:[%s3411_s2 + $0x38] sm:$0xff]  ;;  %v31_v29 = vld [vmem:[%s3411_s2 + $0x30] sm:$0xff]  ;;  %v2733_v10 = vshrl.u32 %v139_v9, 7 }
   0xb   :  { %155 = vmatprep.subr.mxu1 %v48_v12  ;;  %v30_v30 = vld [vmem:[%s3411_s2 + $0x28] sm:$0xff]  ;;  %v29_v31 = vld [vmem:[%s3411_s2 + $0x20] sm:$0xff]  ;;  %v28_v32 = vld [vmem:[%s3411_s2 + $0x18] sm:$0xff] }
   0xc   :  { %156 = vmatpush1.msra.mxu1 %v47_v13  ;;  %v27_v33 = vld [vmem:[%s3411_s2 + $0x10] sm:$0xff]  ;;  %v26_v34 = vld [vmem:[%s3411_s2 + $0x8] sm:$0xff]  ;;  %v25_v35 = vld [vmem:[%s3411_s2] sm:$0xff]  ;;  %v2736_v11 = vsub.s32 0, %v2733_v10 }
   0xd   :  { %157 = vmatprep.subr.mxu1 %v46_v14  ;;  %v259_v37 = vld [vmem:[%s3411_s2 + $0x2f0] sm:$0xff]  ;;  %v258_v39 = vld [vmem:[%s3411_s2 + $0x2e0] sm:$0xff]  ;;  %v22_v13 = vld [vmem:[%s3412_s3 + $0x8] sm:$0xff] }
   0xe   :  { %158 = vmatpush1.msra.mxu1 %v45_v15  ;;  %v243_v38 = vld [vmem:[%s3411_s2 + $0x1f0] sm:$0xff]  ;;  %1900 = vmatprep.subr.mxu0 %v259_v37  ;;  %v242_v40 = vld [vmem:[%s3411_s2 + $0x1e0] sm:$0xff]  ;;  %v146_v15 = vrot.slane %v22_v13, %v2736_v11 }
   0xf   :  { %159 = vmatprep.subr.mxu1 %v44_v16  ;;  %1901 = vmatpush3.msra.mxu0 %v243_v38  ;;  %v257_v41 = vld [vmem:[%s3411_s2 + $0x2d0] sm:$0xff]  ;;  %v256_v43 = vld [vmem:[%s3411_s2 + $0x2c0] sm:$0xff] }
  0x10   :  { %160 = vmatpush1.msra.mxu1 %v43_v17  ;;  %1902 = vmatprep.subr.mxu0 %v258_v39  ;;  %v241_v42 = vld [vmem:[%s3411_s2 + $0x1d0] sm:$0xff]  ;;  %v240_v44 = vld [vmem:[%s3411_s2 + $0x1c0] sm:$0xff] }
  0x11   :  { %161 = vmatprep.subr.mxu1 %v42_v18  ;;  %1903 = vmatpush3.msra.mxu0 %v242_v40  ;;  %v255_v45 = vld [vmem:[%s3411_s2 + $0x2b0] sm:$0xff]  ;;  %v254_v47 = vld [vmem:[%s3411_s2 + $0x2a0] sm:$0xff] }
  0x12   :  { %162 = vmatpush1.msra.mxu1 %v41_v19  ;;  %1904 = vmatprep.subr.mxu0 %v257_v41  ;;  %v239_v46 = vld [vmem:[%s3411_s2 + $0x1b0] sm:$0xff]  ;;  %v238_v48 = vld [vmem:[%s3411_s2 + $0x1a0] sm:$0xff] }
  0x13   :  { %163 = vmatprep.subr.mxu1 %v40_v20  ;;  %1905 = vmatpush3.msra.mxu0 %v241_v42  ;;  %v253_v49 = vld [vmem:[%s3411_s2 + $0x290] sm:$0xff]  ;;  %v252_v51 = vld [vmem:[%s3411_s2 + $0x280] sm:$0xff] }
  0x14   :  { %164 = vmatpush1.msra.mxu1 %v39_v21  ;;  %1906 = vmatprep.subr.mxu0 %v256_v43  ;;  %v237_v50 = vld [vmem:[%s3411_s2 + $0x190] sm:$0xff]  ;;  %v236_v52 = vld [vmem:[%s3411_s2 + $0x180] sm:$0xff] }
  0x15   :  { %165 = vmatprep.subr.mxu1 %v38_v22  ;;  %1907 = vmatpush3.msra.mxu0 %v240_v44  ;;  %v251_v53 = vld [vmem:[%s3411_s2 + $0x270] sm:$0xff]  ;;  %v250_v55 = vld [vmem:[%s3411_s2 + $0x260] sm:$0xff] }
  0x16   :  { %166 = vmatpush1.msra.mxu1 %v37_v23  ;;  %1908 = vmatprep.subr.mxu0 %v255_v45  ;;  %v235_v54 = vld [vmem:[%s3411_s2 + $0x170] sm:$0xff]  ;;  %v234_v56 = vld [vmem:[%s3411_s2 + $0x160] sm:$0xff] }
  0x17   :  { %167 = vmatprep.subr.mxu1 %v36_v24  ;;  %1909 = vmatpush3.msra.mxu0 %v239_v46  ;;  %v249_v57 = vld [vmem:[%s3411_s2 + $0x250] sm:$0xff]  ;;  %v248_v59 = vld [vmem:[%s3411_s2 + $0x240] sm:$0xff] }
  0x18   :  { %168 = vmatpush1.msra.mxu1 %v35_v25  ;;  %1910 = vmatprep.subr.mxu0 %v254_v47  ;;  %v233_v58 = vld [vmem:[%s3411_s2 + $0x150] sm:$0xff]  ;;  %v232_v60 = vld [vmem:[%s3411_s2 + $0x140] sm:$0xff] }
  0x19   :  { %169 = vmatprep.subr.mxu1 %v34_v26  ;;  %1911 = vmatpush3.msra.mxu0 %v238_v48  ;;  %v247_v63 = vld [vmem:[%s3411_s2 + $0x230] sm:$0xff]  ;;  %v246_v1 = vld [vmem:[%s3411_s2 + $0x220] sm:$0xff] }
  0x1a   :  { %170 = vmatpush1.msra.mxu1 %v33_v27  ;;  %1912 = vmatprep.subr.mxu0 %v253_v49  ;;  %v231_v0 = vld [vmem:[%s3411_s2 + $0x130] sm:$0xff]  ;;  %v230_v3 = vld [vmem:[%s3411_s2 + $0x120] sm:$0xff] }
  0x1b   :  { %171 = vmatprep.subr.mxu1 %v32_v28  ;;  %1913 = vmatpush3.msra.mxu0 %v237_v50  ;;  %v245_v4 = vld [vmem:[%s3411_s2 + $0x210] sm:$0xff]  ;;  %v244_v7 = vld [vmem:[%s3411_s2 + $0x200] sm:$0xff] }
  0x1c   :  { %172 = vmatpush1.msra.mxu1 %v31_v29  ;;  %1914 = vmatprep.subr.mxu0 %v252_v51  ;;  %v229_v6 = vld [vmem:[%s3411_s2 + $0x110] sm:$0xff]  ;;  %v228_v8 = vld [vmem:[%s3411_s2 + $0x100] sm:$0xff]  ;;  %v337_v51 = vsub.s32 1, %v2733_v10 }
  0x1d   :  { %173 = vmatprep.subr.mxu1 %v30_v30  ;;  %1915 = vmatpush3.msra.mxu0 %v236_v52  ;;  %v2741_v12 = vld [vmem:[%s3412_s3] sm:$0xff]  ;;  %v431_v28 = vld [vmem:[%s3411_s2 + $0x3f0] sm:$0xff] }
  0x1e   :  { %174 = vmatpush1.msra.mxu1 %v29_v31  ;;  %1916 = vmatprep.subr.mxu0 %v251_v53  ;;  %v142_v14 = vrot.slane %v2741_v12, %v2736_v11  ;;  %v430_v29 = vld [vmem:[%s3411_s2 + $0x3e0] sm:$0xff]  ;;  %v429_v30 = vld [vmem:[%s3411_s2 + $0x3d0] sm:$0xff]  ;;  %v338_v52 = vrot.slane %v2741_v12, %v337_v51 }
  0x1f   :  { %175 = vmatprep.subr.mxu1 %v28_v32  ;;  %1917 = vmatpush3.msra.mxu0 %v235_v54  ;;  %v428_v31 = vld [vmem:[%s3411_s2 + $0x3c0] sm:$0xff]  ;;  %v427_v32 = vld [vmem:[%s3411_s2 + $0x3b0] sm:$0xff] }
  0x20   :  { %176 = vmatpush1.msra.mxu1 %v27_v33  ;;  %1918 = vmatprep.subr.mxu0 %v250_v55  ;;  %v426_v33 = vld [vmem:[%s3411_s2 + $0x3a0] sm:$0xff]  ;;  %v423_v37 = vld [vmem:[%s3411_s2 + $0x370] sm:$0xff] }
  0x21   :  { %177 = vmatprep.subr.mxu1 %v26_v34  ;;  %1919 = vmatpush3.msra.mxu0 %v234_v56  ;;  %v425_v34 = vld [vmem:[%s3411_s2 + $0x390] sm:$0xff]  ;;  %v422_v38 = vld [vmem:[%s3411_s2 + $0x360] sm:$0xff] }
  0x22   :  { %178 = vmatpush1.msra.mxu1 %v25_v35  ;;  %1920 = vmatprep.subr.mxu0 %v249_v57  ;;  %v424_v35 = vld [vmem:[%s3411_s2 + $0x380] sm:$0xff]  ;;  %v421_v39 = vld [vmem:[%s3411_s2 + $0x350] sm:$0xff] }
  0x23   :  { %1921 = vmatpush3.msra.mxu0 %v233_v58  ;;  %v420_v40 = vld [vmem:[%s3411_s2 + $0x340] sm:$0xff]  ;;  %v419_v47 = vld [vmem:[%s3411_s2 + $0x330] sm:$0xff] }
  0x24   :  { %1922 = vmatprep.subr.mxu0 %v248_v59  ;;  %v418_v48 = vld [vmem:[%s3411_s2 + $0x320] sm:$0xff]  ;;  %v417_v49 = vld [vmem:[%s3411_s2 + $0x310] sm:$0xff] }
  0x25   :  { %1923 = vmatpush3.msra.mxu0 %v232_v60  ;;  %v416_v50 = vld [vmem:[%s3411_s2 + $0x300] sm:$0xff]  ;;  %v591_v13 = vld [vmem:[%s3411_s2 + $0x430] sm:$0xff] }
  0x26   :  { %1924 = vmatprep.subr.mxu0 %v247_v63  ;;  %v600_v63 = vld [vmem:[%s3411_s2 + $0x4c0] sm:$0xff] }
  0x27   :  { %1925 = vmatpush3.msra.mxu0 %v231_v0  ;;  %v599_v0 = vld [vmem:[%s3411_s2 + $0x4b0] sm:$0xff]  ;;  %v592_v9 = vld [vmem:[%s3411_s2 + $0x440] sm:$0xff] }
  0x28   :  { %1926 = vmatprep.subr.mxu0 %v246_v1  ;;  %v598_v1 = vld [vmem:[%s3411_s2 + $0x4a0] sm:$0xff] }
  0x29   :  { %1927 = vmatpush3.msra.mxu0 %v230_v3  ;;  %v597_v3 = vld [vmem:[%s3411_s2 + $0x490] sm:$0xff] }
  0x2a   :  { %1928 = vmatprep.subr.mxu0 %v245_v4  ;;  %v596_v4 = vld [vmem:[%s3411_s2 + $0x480] sm:$0xff] }
  0x2b   :  { %1929 = vmatpush3.msra.mxu0 %v229_v6  ;;  %v595_v6 = vld [vmem:[%s3411_s2 + $0x470] sm:$0xff] }
  0x2c   :  { %1930 = vmatprep.subr.mxu0 %v244_v7  ;;  %v594_v7 = vld [vmem:[%s3411_s2 + $0x460] sm:$0xff] }
  0x2d   :  { %1931 = vmatpush3.msra.mxu0 %v228_v8  ;;  %v593_v8 = vld [vmem:[%s3411_s2 + $0x450] sm:$0xff] }
  0x2e   :  { %2162 = vmatprep.subr.mxu0 %v431_v28 }
  0xc6   :  { %v2154_v61 = vpop.f32.mrf.mxu0 }
  0xc8   :  { %v130_v62 = vpop.f32.mrf.mxu0 }
  0xc9   :  { %212 = vmatmul.mubr.f32.vlgmr.msra.gmra.mxu1 %v130_v62  ;;  %v602_v62 = vld [vmem:[%s3411_s2 + $0x4e0] sm:$0xff] }
  0xca   :  { %217 = vmatprep.mubr.f32.mxu1 %v2491_v36 }
  0xcd   :  { %218 = vmatmul.mubr.f32.gmra.mxu1 %v2154_v61  ;;  %v603_v61 = vld [vmem:[%s3411_s2 + $0x4f0] sm:$0xff] }
  0xce   :  { %2159 = vmatprep.mubr.msk.f32.mxu1 %vm57_vm0, %v2526_v2 }
 0x189   :  { %v213_v16 = vpop.f32.mrf.mxu1 }
 0x18a   :  { %v214_v17 = vadd.f32 %v213_v16, %v142_v14  ;;  %v588_v16 = vld [vmem:[%s3411_s2 + $0x400] sm:$0xff] }
 0x18b   :  { %v215_v18 = vpop.f32.mrf.mxu1 }
 0x18c   :  { %v216_v19 = vadd.f32 %v215_v18, %v146_v15  ;;  %v224_v22 = vmax.f32 %v214_v17, 0.0  ;;  %v2858_v17 = vsub.s32 2, %v2733_v10 }
 0x18d   :  { %v219_v20 = vpop.f32.mrf.mxu1 }
 0x18e   :  { %v225_v21 = vmax.f32 %v216_v19, 0.0  ;;  %v220_v23 = vadd.f32 %v219_v20, %v142_v14  ;;  %v590_v14 = vld [vmem:[%s3411_s2 + $0x420] sm:$0xff]  ;;  %v510_v18 = vrot.slane %v2741_v12, %v2858_v17 }
 0x18f   :  { %v221_v24 = vpop.f32.mrf.mxu1 }
 0x190   :  { %v222_v25 = vadd.f32 %v221_v24, %v146_v15  ;;  %324 = vmatprep.mubr.f32.mxu0 %v225_v21  ;;  %v226_v27 = vmax.f32 %v220_v23, 0.0  ;;  %v589_v15 = vld [vmem:[%s3411_s2 + $0x410] sm:$0xff] }
 0x191   :  { %325 = vmatmul.mubr.f32.vlgmr.msra.gmra.mxu0 %v224_v22 }
 0x192   :  { %v227_v26 = vmax.f32 %v222_v25, 0.0  ;;  %2163 = vmatpush3.msra.mxu0 %v431_v28  ;;  %v774_v28 = vld [vmem:[%s3411_s2 + $0x5e0] sm:$0xff] }
 0x193   :  { %2164 = vmatprep.subr.mxu0 %v430_v29 }
 0x194   :  { %329 = vmatprep.mubr.f32.mxu0 %v227_v26  ;;  %2165 = vmatpush3.msra.mxu0 %v430_v29  ;;  %v773_v29 = vld [vmem:[%s3411_s2 + $0x5d0] sm:$0xff] }
 0x195   :  { %330 = vmatmul.mubr.f32.gmra.mxu0 %v226_v27  ;;  %2166 = vmatprep.subr.mxu0 %v429_v30  ;;  %v775_v27 = vld [vmem:[%s3411_s2 + $0x5f0] sm:$0xff] }
 0x196   :  { %2167 = vmatpush3.msra.mxu0 %v429_v30  ;;  %v772_v30 = vld [vmem:[%s3411_s2 + $0x5c0] sm:$0xff] }
 0x197   :  { %2168 = vmatprep.subr.mxu0 %v428_v31 }
 0x198   :  { %2169 = vmatpush3.msra.mxu0 %v428_v31  ;;  %v771_v31 = vld [vmem:[%s3411_s2 + $0x5b0] sm:$0xff] }
 0x199   :  { %2170 = vmatprep.subr.mxu0 %v427_v32 }
 0x19a   :  { %2171 = vmatpush3.msra.mxu0 %v427_v32  ;;  %v769_v32 = vld [vmem:[%s3411_s2 + $0x590] sm:$0xff] }
 0x19b   :  { %2172 = vmatprep.subr.mxu0 %v426_v33 }
 0x19c   :  { %2173 = vmatpush3.msra.mxu0 %v426_v33  ;;  %v768_v33 = vld [vmem:[%s3411_s2 + $0x580] sm:$0xff] }
 0x19d   :  { %2174 = vmatprep.subr.mxu0 %v425_v34 }
 0x19e   :  { %2175 = vmatpush3.msra.mxu0 %v425_v34  ;;  %v767_v34 = vld [vmem:[%s3411_s2 + $0x570] sm:$0xff] }
 0x19f   :  { %2176 = vmatprep.subr.mxu0 %v424_v35 }
 0x1a0   :  { %2177 = vmatpush3.msra.mxu0 %v424_v35  ;;  %v766_v35 = vld [vmem:[%s3411_s2 + $0x560] sm:$0xff] }
 0x1a1   :  { %2178 = vmatprep.subr.mxu0 %v423_v37 }
 0x1a2   :  { %2179 = vmatpush3.msra.mxu0 %v423_v37  ;;  %v765_v37 = vld [vmem:[%s3411_s2 + $0x550] sm:$0xff] }
 0x1a3   :  { %2180 = vmatprep.subr.mxu0 %v422_v38 }
 0x1a4   :  { %2181 = vmatpush3.msra.mxu0 %v422_v38  ;;  %v764_v38 = vld [vmem:[%s3411_s2 + $0x540] sm:$0xff] }
 0x1a5   :  { %2182 = vmatprep.subr.mxu0 %v421_v39 }
 0x1a6   :  { %2183 = vmatpush3.msra.mxu0 %v421_v39  ;;  %v763_v39 = vld [vmem:[%s3411_s2 + $0x530] sm:$0xff] }
 0x1a7   :  { %2184 = vmatprep.subr.mxu0 %v420_v40 }
 0x1a8   :  { %2185 = vmatpush3.msra.mxu0 %v420_v40  ;;  %v762_v40 = vld [vmem:[%s3411_s2 + $0x520] sm:$0xff] }
 0x1a9   :  { %2186 = vmatprep.subr.mxu0 %v419_v47 }
 0x1aa   :  { %2187 = vmatpush3.msra.mxu0 %v419_v47  ;;  %v868_v47 = vld [vmem:[%s3411_s2 + $0x6b0] sm:$0xff] }
 0x1ab   :  { %2188 = vmatprep.subr.mxu0 %v418_v48 }
 0x1ac   :  { %2189 = vmatpush3.msra.mxu0 %v418_v48  ;;  %v867_v48 = vld [vmem:[%s3411_s2 + $0x6a0] sm:$0xff] }
 0x1ad   :  { %2190 = vmatprep.subr.mxu0 %v417_v49 }
 0x1ae   :  { %2191 = vmatpush3.msra.mxu0 %v417_v49  ;;  %v866_v49 = vld [vmem:[%s3411_s2 + $0x690] sm:$0xff] }
 0x1af   :  { %2192 = vmatprep.subr.mxu0 %v416_v50 }
 0x1b0   :  { %2193 = vmatpush3.msra.mxu0 %v416_v50  ;;  %v865_v50 = vld [vmem:[%s3411_s2 + $0x680] sm:$0xff] }
 0x251   :  { %v1932_v41 = vpop.f32.mrf.mxu0 }
 0x253   :  { %v1933_v42 = vpop.f32.mrf.mxu0 }
 0x254   :  { %v1934_v46 = vadd.f32 %v1933_v42, %v1932_v41  ;;  %v761_v41 = vld [vmem:[%s3411_s2 + $0x510] sm:$0xff]  ;;  %v760_v42 = vld [vmem:[%s3411_s2 + $0x500] sm:$0xff] }
 0x255   :  { %v1935_v43 = vpop.f32.mrf.mxu0 }
 0x257   :  { %v1936_v44 = vpop.f32.mrf.mxu0 }
 0x258   :  { %v1937_v45 = vadd.f32 %v1936_v44, %v1935_v43  ;;  %v872_v43 = vld [vmem:[%s3411_s2 + $0x6f0] sm:$0xff]  ;;  %v871_v44 = vld [vmem:[%s3411_s2 + $0x6e0] sm:$0xff] }
 0x25a   :  { %2155 = vmatprep.subr.mxu1 %v1937_v45 }
 0x25b   :  { %2156 = vmatpush3.msra.mxu1 %v1937_v45  ;;  %v870_v45 = vld [vmem:[%s3411_s2 + $0x6d0] sm:$0xff] }
 0x25c   :  { %2157 = vmatprep.subr.mxu1 %v1934_v46 }
 0x25d   :  { %2158 = vmatpush3.msra.mxu1 %v1934_v46  ;;  %v869_v46 = vld [vmem:[%s3411_s2 + $0x6c0] sm:$0xff] }
 0x25e   :  { %2160 = vmatmul.mubr.msk.f32.vlgmr.msra.gmra.mxu1 %vm57_vm0, %v2539_v5 }
 0x25f   :  { %2201 = vmatprep.mubr.msk.f32.mxu1 %vm57_vm0, %v2526_v2 }
 0x31e   :  { %v2161_v53 = vpop.f32.mrf.mxu1 }
 0x31f   :  { %v411_v54 = vadd.f32 %v2161_v53, %v338_v52  ;;  %v863_v53 = vld [vmem:[%s3411_s2 + $0x660] sm:$0xff] }
 0x320   :  { %v405_v55 = vpop.f32.mrf.mxu1 }
 0x321   :  { %v406_v56 = vadd.f32 %v405_v55, %v338_v52  ;;  %v415_v58 = vmax.f32 %v411_v54, 0.0  ;;  %v864_v52 = vld [vmem:[%s3411_s2 + $0x670] sm:$0xff]  ;;  %v861_v55 = vld [vmem:[%s3411_s2 + $0x640] sm:$0xff] }
 0x322   :  { %v862_v54 = vld [vmem:[%s3411_s2 + $0x650] sm:$0xff] }
 0x323   :  { %v414_v57 = vmax.f32 %v406_v56, 0.0  ;;  %v681_v56 = vsub.s32 3, %v2733_v10 }
 0x325   :  { %2194 = vmatprep.mubr.f32.mxu0 %v414_v57  ;;  %v682_v57 = vrot.slane %v2741_v12, %v681_v56 }
 0x326   :  { %2195 = vmatmul.mubr.f32.vlgmr.msra.gmra.mxu0 %v415_v58 }
 0x327   :  { %2243 = vmatprep.mubr.msk.f32.mxu0 %vm57_vm0, %v2526_v2  ;;  %v601_v2 = vld [vmem:[%s3411_s2 + $0x4d0] sm:$0xff] }
 0x3e6   :  { %v2196_v59 = vpop.f32.mrf.mxu0 }
 0x3e7   :  { %2197 = vmatprep.subr.mxu1 %v2196_v59 }
 0x3e8   :  { %v498_v60 = vpop.f32.mrf.mxu0  ;;  %2198 = vmatpush3.msra.mxu1 %v2196_v59 }
 0x3e9   :  { %2199 = vmatprep.subr.mxu1 %v498_v60 }
 0x3ea   :  { %2200 = vmatpush3.msra.mxu1 %v498_v60 }
 0x3eb   :  { %2202 = vmatmul.mubr.msk.f32.vlgmr.msra.gmra.mxu1 %vm57_vm0, %v2539_v5  ;;  %2204 = vmatprep.subr.mxu1 %v603_v61 }
 0x3ec   :  { %2205 = vmatpush3.msra.mxu1 %v603_v61 }
 0x3ed   :  { %2206 = vmatprep.subr.mxu1 %v602_v62 }
 0x3ee   :  { %2207 = vmatpush3.msra.mxu1 %v602_v62 }
 0x3ef   :  { %2208 = vmatprep.subr.mxu1 %v601_v2 }
 0x3f0   :  { %2209 = vmatpush3.msra.mxu1 %v601_v2 }
 0x3f1   :  { %2210 = vmatprep.subr.mxu1 %v600_v63 }
 0x3f2   :  { %2211 = vmatpush3.msra.mxu1 %v600_v63  ;;  %v860_v63 = vld [vmem:[%s3411_s2 + $0x630] sm:$0xff] }
 0x3f3   :  { %2212 = vmatprep.subr.mxu1 %v599_v0 }
 0x3f4   :  { %2213 = vmatpush3.msra.mxu1 %v599_v0  ;;  %v859_v0 = vld [vmem:[%s3411_s2 + $0x620] sm:$0xff] }
 0x3f5   :  { %2214 = vmatprep.subr.mxu1 %v598_v1 }
 0x3f6   :  { %2215 = vmatpush3.msra.mxu1 %v598_v1  ;;  %v858_v1 = vld [vmem:[%s3411_s2 + $0x610] sm:$0xff] }
 0x3f7   :  { %2216 = vmatprep.subr.mxu1 %v597_v3 }
 0x3f8   :  { %2217 = vmatpush3.msra.mxu1 %v597_v3  ;;  %v857_v3 = vld [vmem:[%s3411_s2 + $0x600] sm:$0xff] }
 0x3f9   :  { %2218 = vmatprep.subr.mxu1 %v596_v4 }
 0x3fa   :  { %2219 = vmatpush3.msra.mxu1 %v596_v4  ;;  %v967_v4 = vld [vmem:[%s3411_s2 + $0x7f0] sm:$0xff] }
 0x3fb   :  { %2220 = vmatprep.subr.mxu1 %v595_v6 }
 0x3fc   :  { %2221 = vmatpush3.msra.mxu1 %v595_v6  ;;  %v966_v6 = vld [vmem:[%s3411_s2 + $0x7e0] sm:$0xff] }
 0x3fd   :  { %2222 = vmatprep.subr.mxu1 %v594_v7 }
 0x3fe   :  { %2223 = vmatpush3.msra.mxu1 %v594_v7  ;;  %v965_v7 = vld [vmem:[%s3411_s2 + $0x7d0] sm:$0xff] }
 0x3ff   :  { %2224 = vmatprep.subr.mxu1 %v593_v8 }
 0x400   :  { %2225 = vmatpush3.msra.mxu1 %v593_v8  ;;  %v964_v8 = vld [vmem:[%s3411_s2 + $0x7c0] sm:$0xff] }
 0x401   :  { %2226 = vmatprep.subr.mxu1 %v592_v9 }
 0x402   :  { %2227 = vmatpush3.msra.mxu1 %v592_v9  ;;  %v963_v9 = vld [vmem:[%s3411_s2 + $0x7b0] sm:$0xff] }
 0x403   :  { %2228 = vmatprep.subr.mxu1 %v591_v13 }
 0x404   :  { %2229 = vmatpush3.msra.mxu1 %v591_v13  ;;  %v962_v13 = vld [vmem:[%s3411_s2 + $0x7a0] sm:$0xff] }
 0x405   :  { %2230 = vmatprep.subr.mxu1 %v590_v14 }
 0x406   :  { %2231 = vmatpush3.msra.mxu1 %v590_v14  ;;  %v961_v14 = vld [vmem:[%s3411_s2 + $0x790] sm:$0xff] }
 0x407   :  { %2232 = vmatprep.subr.mxu1 %v589_v15 }
 0x408   :  { %2233 = vmatpush3.msra.mxu1 %v589_v15  ;;  %v960_v15 = vld [vmem:[%s3411_s2 + $0x780] sm:$0xff] }
 0x409   :  { %2234 = vmatprep.subr.mxu1 %v588_v16 }
 0x40a   :  { %2235 = vmatpush3.msra.mxu1 %v588_v16  ;;  %v959_v16 = vld [vmem:[%s3411_s2 + $0x770] sm:$0xff] }
 0x40b   :  { %2281 = vmatprep.subr.mxu1 %v872_v43 }
 0x4ab   :  { %v2203_v19 = vpop.f32.mrf.mxu1 }
 0x4ac   :  { %v583_v20 = vadd.f32 %v2203_v19, %v510_v18  ;;  %v957_v19 = vld [vmem:[%s3411_s2 + $0x750] sm:$0xff] }
 0x4ad   :  { %v577_v21 = vpop.f32.mrf.mxu1 }
 0x4ae   :  { %v578_v22 = vadd.f32 %v577_v21, %v510_v18  ;;  %v587_v24 = vmax.f32 %v583_v20, 0.0  ;;  %v958_v18 = vld [vmem:[%s3411_s2 + $0x760] sm:$0xff]  ;;  %v955_v21 = vld [vmem:[%s3411_s2 + $0x730] sm:$0xff] }
 0x4af   :  { %v956_v20 = vld [vmem:[%s3411_s2 + $0x740] sm:$0xff] }
 0x4b0   :  { %v586_v23 = vmax.f32 %v578_v22, 0.0  ;;  %v778_v22 = vsub.s32 4, %v2733_v10 }
 0x4b2   :  { %2236 = vmatprep.mubr.f32.mxu1 %v586_v23  ;;  %v779_v23 = vrot.slane %v2741_v12, %v778_v22  ;;  %v1146_v22 = vld [vmem:[%s3411_s2 + $0x900] sm:$0xff] }
 0x4b3   :  { %2237 = vmatmul.mubr.f32.vlgmr.msra.gmra.mxu1 %v587_v24 }
 0x4b4   :  { %2282 = vmatpush3.msra.mxu1 %v872_v43  ;;  %v1054_v43 = vld [vmem:[%s3411_s2 + $0x850] sm:$0xff] }
 0x4b5   :  { %2283 = vmatprep.subr.mxu1 %v871_v44 }
 0x4b6   :  { %2284 = vmatpush3.msra.mxu1 %v871_v44  ;;  %v1053_v44 = vld [vmem:[%s3411_s2 + $0x840] sm:$0xff] }
 0x4b7   :  { %2285 = vmatprep.subr.mxu1 %v870_v45 }
 0x4b8   :  { %2286 = vmatpush3.msra.mxu1 %v870_v45  ;;  %v875_v45 = vsub.s32 5, %v2733_v10 }
 0x4b9   :  { %2287 = vmatprep.subr.mxu1 %v869_v46 }
 0x4ba   :  { %2288 = vmatpush3.msra.mxu1 %v869_v46  ;;  %v876_v46 = vrot.slane %v2741_v12, %v875_v45  ;;  %v1321_v45 = vld [vmem:[%s3411_s2 + $0xa30] sm:$0xff] }
 0x4bb   :  { %2289 = vmatprep.subr.mxu1 %v868_v47 }
 0x4bc   :  { %2290 = vmatpush3.msra.mxu1 %v868_v47 }
 0x4bd   :  { %2291 = vmatprep.subr.mxu1 %v867_v48 }
 0x4be   :  { %2292 = vmatpush3.msra.mxu1 %v867_v48 }
 0x4bf   :  { %2293 = vmatprep.subr.mxu1 %v866_v49 }
 0x4c0   :  { %2294 = vmatpush3.msra.mxu1 %v866_v49 }
 0x4c1   :  { %2295 = vmatprep.subr.mxu1 %v865_v50 }
 0x4c2   :  { %2296 = vmatpush3.msra.mxu1 %v865_v50 }
 0x4c3   :  { %2297 = vmatprep.subr.mxu1 %v864_v52 }
 0x4c4   :  { %2298 = vmatpush3.msra.mxu1 %v864_v52  ;;  %v1052_v52 = vld [vmem:[%s3411_s2 + $0x830] sm:$0xff] }
 0x4c5   :  { %2299 = vmatprep.subr.mxu1 %v863_v53 }
 0x4c6   :  { %2300 = vmatpush3.msra.mxu1 %v863_v53  ;;  %v1051_v53 = vld [vmem:[%s3411_s2 + $0x820] sm:$0xff] }
 0x4c7   :  { %2301 = vmatprep.subr.mxu1 %v862_v54 }
 0x4c8   :  { %2302 = vmatpush3.msra.mxu1 %v862_v54  ;;  %v1050_v54 = vld [vmem:[%s3411_s2 + $0x810] sm:$0xff] }
 0x4c9   :  { %2303 = vmatprep.subr.mxu1 %v861_v55 }
 0x4ca   :  { %2304 = vmatpush3.msra.mxu1 %v861_v55  ;;  %v1049_v55 = vld [vmem:[%s3411_s2 + $0x800] sm:$0xff] }
 0x4cb   :  { %2305 = vmatprep.subr.mxu1 %v860_v63 }
 0x4cc   :  { %2306 = vmatpush3.msra.mxu1 %v860_v63  ;;  %v1154_v63 = vld [vmem:[%s3411_s2 + $0x980] sm:$0xff] }
 0x4cd   :  { %2307 = vmatprep.subr.mxu1 %v859_v0 }
 0x4ce   :  { %2308 = vmatpush3.msra.mxu1 %v859_v0  ;;  %v1153_v0 = vld [vmem:[%s3411_s2 + $0x970] sm:$0xff] }
 0x4cf   :  { %2309 = vmatprep.subr.mxu1 %v858_v1 }
 0x4d0   :  { %2310 = vmatpush3.msra.mxu1 %v858_v1  ;;  %v1152_v1 = vld [vmem:[%s3411_s2 + $0x960] sm:$0xff] }
 0x4d1   :  { %2311 = vmatprep.subr.mxu1 %v857_v3 }
 0x4d2   :  { %2312 = vmatpush3.msra.mxu1 %v857_v3  ;;  %v1151_v3 = vld [vmem:[%s3411_s2 + $0x950] sm:$0xff] }
 0x573   :  { %v2238_v25 = vpop.f32.mrf.mxu1 }
 0x574   :  { %2239 = vmatprep.subr.mxu0 %v2238_v25 }
 0x575   :  { %v670_v26 = vpop.f32.mrf.mxu1  ;;  %2240 = vmatpush3.msra.mxu0 %v2238_v25 }
 0x576   :  { %2241 = vmatprep.subr.mxu0 %v670_v26 }
 0x577   :  { %2242 = vmatpush3.msra.mxu0 %v670_v26 }
 0x578   :  { %2244 = vmatmul.mubr.msk.f32.vlgmr.msra.gmra.mxu0 %vm57_vm0, %v2539_v5  ;;  %2246 = vmatprep.subr.mxu0 %v775_v27  ;;  %v770_v5 = vld [vmem:[%s3411_s2 + $0x5a0] sm:$0xff] }
 0x579   :  { %2247 = vmatpush3.msra.mxu0 %v775_v27 }
 0x57a   :  { %2248 = vmatprep.subr.mxu0 %v774_v28 }
 0x57b   :  { %2249 = vmatpush3.msra.mxu0 %v774_v28 }
 0x57c   :  { %2250 = vmatprep.subr.mxu0 %v773_v29 }
 0x57d   :  { %2251 = vmatpush3.msra.mxu0 %v773_v29 }
 0x57e   :  { %2252 = vmatprep.subr.mxu0 %v772_v30 }
 0x57f   :  { %2253 = vmatpush3.msra.mxu0 %v772_v30  ;;  %v954_v30 = vld [vmem:[%s3411_s2 + $0x720] sm:$0xff] }
 0x580   :  { %2254 = vmatprep.subr.mxu0 %v771_v31 }
 0x581   :  { %2255 = vmatpush3.msra.mxu0 %v771_v31  ;;  %v953_v31 = vld [vmem:[%s3411_s2 + $0x710] sm:$0xff] }
 0x582   :  { %2256 = vmatprep.subr.mxu0 %v770_v5 }
 0x583   :  { %2257 = vmatpush3.msra.mxu0 %v770_v5  ;;  %v952_v5 = vld [vmem:[%s3411_s2 + $0x700] sm:$0xff] }
 0x584   :  { %2258 = vmatprep.subr.mxu0 %v769_v32 }
 0x585   :  { %2259 = vmatpush3.msra.mxu0 %v769_v32  ;;  %v1064_v32 = vld [vmem:[%s3411_s2 + $0x8f0] sm:$0xff] }
 0x586   :  { %2260 = vmatprep.subr.mxu0 %v768_v33  ;;  %2351 = vmatprep.subr.mxu1 %v1064_v32 }
 0x587   :  { %2261 = vmatpush3.msra.mxu0 %v768_v33  ;;  %v1063_v33 = vld [vmem:[%s3411_s2 + $0x8e0] sm:$0xff] }
 0x588   :  { %2262 = vmatprep.subr.mxu0 %v767_v34 }
 0x589   :  { %2263 = vmatpush3.msra.mxu0 %v767_v34  ;;  %v1062_v34 = vld [vmem:[%s3411_s2 + $0x8d0] sm:$0xff] }
 0x58a   :  { %2264 = vmatprep.subr.mxu0 %v766_v35 }
 0x58b   :  { %2265 = vmatpush3.msra.mxu0 %v766_v35  ;;  %v1061_v35 = vld [vmem:[%s3411_s2 + $0x8c0] sm:$0xff] }
 0x58c   :  { %2266 = vmatprep.subr.mxu0 %v765_v37 }
 0x58d   :  { %2267 = vmatpush3.msra.mxu0 %v765_v37  ;;  %v1060_v37 = vld [vmem:[%s3411_s2 + $0x8b0] sm:$0xff] }
 0x58e   :  { %2268 = vmatprep.subr.mxu0 %v764_v38 }
 0x58f   :  { %2269 = vmatpush3.msra.mxu0 %v764_v38  ;;  %v1059_v38 = vld [vmem:[%s3411_s2 + $0x8a0] sm:$0xff] }
 0x590   :  { %2270 = vmatprep.subr.mxu0 %v763_v39 }
 0x591   :  { %2271 = vmatpush3.msra.mxu0 %v763_v39  ;;  %v1058_v39 = vld [vmem:[%s3411_s2 + $0x890] sm:$0xff] }
 0x592   :  { %2272 = vmatprep.subr.mxu0 %v762_v40 }
 0x593   :  { %2273 = vmatpush3.msra.mxu0 %v762_v40  ;;  %v1057_v40 = vld [vmem:[%s3411_s2 + $0x880] sm:$0xff] }
 0x594   :  { %2274 = vmatprep.subr.mxu0 %v761_v41 }
 0x595   :  { %2275 = vmatpush3.msra.mxu0 %v761_v41  ;;  %v1056_v41 = vld [vmem:[%s3411_s2 + $0x870] sm:$0xff] }
 0x596   :  { %2276 = vmatprep.subr.mxu0 %v760_v42 }
 0x597   :  { %2277 = vmatpush3.msra.mxu0 %v760_v42  ;;  %v1055_v42 = vld [vmem:[%s3411_s2 + $0x860] sm:$0xff] }
 0x598   :  { %2316 = vmatprep.subr.mxu0 %v967_v4 }
 0x638   :  { %v2245_v58 = vpop.f32.mrf.mxu0 }
 0x639   :  { %v755_v59 = vadd.f32 %v2245_v58, %v682_v57  ;;  %v1160_v58 = vld [vmem:[%s3411_s2 + $0x9e0] sm:$0xff] }
 0x63a   :  { %v749_v60 = vpop.f32.mrf.mxu0 }
 0x63b   :  { %v750_v61 = vadd.f32 %v749_v60, %v682_v57  ;;  %v759_v2 = vmax.f32 %v755_v59, 0.0  ;;  %v1161_v57 = vld [vmem:[%s3411_s2 + $0x9f0] sm:$0xff]  ;;  %v1158_v60 = vld [vmem:[%s3411_s2 + $0x9c0] sm:$0xff] }
 0x63c   :  { %v1159_v59 = vld [vmem:[%s3411_s2 + $0x9d0] sm:$0xff] }
 0x63d   :  { %v758_v62 = vmax.f32 %v750_v61, 0.0  ;;  %v1157_v61 = vld [vmem:[%s3411_s2 + $0x9b0] sm:$0xff] }
 0x63f   :  { %2278 = vmatprep.mubr.f32.mxu0 %v758_v62  ;;  %v1156_v62 = vld [vmem:[%s3411_s2 + $0x9a0] sm:$0xff] }
 0x640   :  { %2279 = vmatmul.mubr.f32.vlgmr.msra.gmra.mxu0 %v759_v2  ;;  %v1155_v2 = vld [vmem:[%s3411_s2 + $0x990] sm:$0xff] }
 0x641   :  { %2317 = vmatpush3.msra.mxu0 %v967_v4  ;;  %v1150_v4 = vld [vmem:[%s3411_s2 + $0x940] sm:$0xff] }
 0x642   :  { %2318 = vmatprep.subr.mxu0 %v966_v6 }
 0x643   :  { %2319 = vmatpush3.msra.mxu0 %v966_v6  ;;  %v970_v6 = vsub.s32 6, %v2733_v10 }
 0x644   :  { %2320 = vmatprep.subr.mxu0 %v965_v7 }
 0x645   :  { %2321 = vmatpush3.msra.mxu0 %v965_v7  ;;  %v971_v7 = vrot.slane %v2741_v12, %v970_v6  ;;  %v1518_v6 = vld [vmem:[%s3411_s2 + $0xbe0] sm:$0xff] }
 0x646   :  { %2322 = vmatprep.subr.mxu0 %v964_v8 }
 0x647   :  { %2323 = vmatpush3.msra.mxu0 %v964_v8 }
 0x648   :  { %2324 = vmatprep.subr.mxu0 %v963_v9 }
 0x649   :  { %2325 = vmatpush3.msra.mxu0 %v963_v9 }
 0x64a   :  { %2326 = vmatprep.subr.mxu0 %v962_v13 }
 0x64b   :  { %2327 = vmatpush3.msra.mxu0 %v962_v13 }
 0x64c   :  { %2328 = vmatprep.subr.mxu0 %v961_v14 }
 0x64d   :  { %2329 = vmatpush3.msra.mxu0 %v961_v14 }
 0x64e   :  { %2330 = vmatprep.subr.mxu0 %v960_v15 }
 0x64f   :  { %2331 = vmatpush3.msra.mxu0 %v960_v15 }
 0x650   :  { %2332 = vmatprep.subr.mxu0 %v959_v16 }
 0x651   :  { %2333 = vmatpush3.msra.mxu0 %v959_v16 }
 0x652   :  { %2334 = vmatprep.subr.mxu0 %v958_v18 }
 0x653   :  { %2335 = vmatpush3.msra.mxu0 %v958_v18  ;;  %v3105_v18 = vld [vmem:[%s3410_s0] sm:$0xff] }
 0x654   :  { %2336 = vmatprep.subr.mxu0 %v957_v19 }
 0x655   :  { %2337 = vmatpush3.msra.mxu0 %v957_v19  ;;  %v1149_v19 = vld [vmem:[%s3411_s2 + $0x930] sm:$0xff] }
 0x656   :  { %2338 = vmatprep.subr.mxu0 %v956_v20 }
 0x657   :  { %2339 = vmatpush3.msra.mxu0 %v956_v20  ;;  %v1148_v20 = vld [vmem:[%s3411_s2 + $0x920] sm:$0xff] }
 0x658   :  { %2340 = vmatprep.subr.mxu0 %v955_v21 }
 0x659   :  { %2341 = vmatpush3.msra.mxu0 %v955_v21  ;;  %v1147_v21 = vld [vmem:[%s3411_s2 + $0x910] sm:$0xff] }
 0x65a   :  { %2342 = vmatprep.subr.mxu0 %v954_v30 }
 0x65b   :  { %2343 = vmatpush3.msra.mxu0 %v954_v30 }
 0x65c   :  { %2344 = vmatprep.subr.mxu0 %v953_v31 }
 0x65d   :  { %2345 = vmatpush3.msra.mxu0 %v953_v31 }
 0x65e   :  { %2346 = vmatprep.subr.mxu0 %v952_v5 }
 0x65f   :  { %2347 = vmatpush3.msra.mxu0 %v952_v5 }
 0x660   :  { %2386 = vmatprep.subr.mxu0 %v1161_v57 }
 0x700   :  { %v2280_v24 = vpop.f32.mrf.mxu0 }
 0x701   :  { %v852_v25 = vadd.f32 %v2280_v24, %v779_v23 }
 0x702   :  { %v846_v26 = vpop.f32.mrf.mxu0 }
 0x703   :  { %v847_v27 = vadd.f32 %v846_v26, %v779_v23  ;;  %v856_v29 = vmax.f32 %v852_v25, 0.0  ;;  %v1067_v23 = vsub.s32 7, %v2733_v10 }
 0x705   :  { %v855_v28 = vmax.f32 %v847_v27, 0.0  ;;  %v1068_v24 = vrot.slane %v2741_v12, %v1067_v23  ;;  %v1332_v12 = vld [vmem:[%s3411_s2 + $0xae0] sm:$0xff] }
 0x706   :  { %v1506_v23 = vld [vmem:[%s3411_s2 + $0xb80] sm:$0xff] }
 0x707   :  { %2313 = vmatprep.mubr.f32.mxu1 %v855_v28 }
 0x708   :  { %2314 = vmatmul.mubr.f32.vlgmr.msra.gmra.mxu1 %v856_v29 }
 0x709   :  { %2352 = vmatpush3.msra.mxu1 %v1064_v32  ;;  %v1333_v32 = vld [vmem:[%s3411_s2 + $0xaf0] sm:$0xff] }
 0x70a   :  { %2353 = vmatprep.subr.mxu1 %v1063_v33 }
 0x70b   :  { %2354 = vmatpush3.msra.mxu1 %v1063_v33  ;;  %v3134_v33 = vld [vmem:[%s3410_s0 + $0x8] sm:$0xff] }
 0x70c   :  { %2355 = vmatprep.subr.mxu1 %v1062_v34 }
 0x70d   :  { %2356 = vmatpush3.msra.mxu1 %v1062_v34  ;;  %v1331_v34 = vld [vmem:[%s3411_s2 + $0xad0] sm:$0xff] }
 0x70e   :  { %2357 = vmatprep.subr.mxu1 %v1061_v35 }
 0x70f   :  { %2358 = vmatpush3.msra.mxu1 %v1061_v35  ;;  %v1330_v35 = vld [vmem:[%s3411_s2 + $0xac0] sm:$0xff] }
 0x710   :  { %2359 = vmatprep.subr.mxu1 %v1060_v37 }
 0x711   :  { %2360 = vmatpush3.msra.mxu1 %v1060_v37  ;;  %v1329_v37 = vld [vmem:[%s3411_s2 + $0xab0] sm:$0xff] }
 0x712   :  { %2361 = vmatprep.subr.mxu1 %v1059_v38 }
 0x713   :  { %2362 = vmatpush3.msra.mxu1 %v1059_v38  ;;  %v1328_v38 = vld [vmem:[%s3411_s2 + $0xaa0] sm:$0xff] }
 0x714   :  { %2363 = vmatprep.subr.mxu1 %v1058_v39 }
 0x715   :  { %2364 = vmatpush3.msra.mxu1 %v1058_v39  ;;  %v1327_v39 = vld [vmem:[%s3411_s2 + $0xa90] sm:$0xff] }
 0x716   :  { %2365 = vmatprep.subr.mxu1 %v1057_v40 }
 0x717   :  { %2366 = vmatpush3.msra.mxu1 %v1057_v40  ;;  %v1326_v40 = vld [vmem:[%s3411_s2 + $0xa80] sm:$0xff] }
 0x718   :  { %2367 = vmatprep.subr.mxu1 %v1056_v41 }
 0x719   :  { %2368 = vmatpush3.msra.mxu1 %v1056_v41  ;;  %v1325_v41 = vld [vmem:[%s3411_s2 + $0xa70] sm:$0xff] }
 0x71a   :  { %2369 = vmatprep.subr.mxu1 %v1055_v42 }
 0x71b   :  { %2370 = vmatpush3.msra.mxu1 %v1055_v42  ;;  %v1324_v42 = vld [vmem:[%s3411_s2 + $0xa60] sm:$0xff] }
 0x71c   :  { %2371 = vmatprep.subr.mxu1 %v1054_v43 }
 0x71d   :  { %2372 = vmatpush3.msra.mxu1 %v1054_v43  ;;  %v1323_v43 = vld [vmem:[%s3411_s2 + $0xa50] sm:$0xff] }
 0x71e   :  { %2373 = vmatprep.subr.mxu1 %v1053_v44 }
 0x71f   :  { %2374 = vmatpush3.msra.mxu1 %v1053_v44  ;;  %v1322_v44 = vld [vmem:[%s3411_s2 + $0xa40] sm:$0xff] }
 0x720   :  { %2375 = vmatprep.subr.mxu1 %v1052_v52 }
 0x721   :  { %2376 = vmatpush3.msra.mxu1 %v1052_v52 }
 0x722   :  { %2377 = vmatprep.subr.mxu1 %v1051_v53 }
 0x723   :  { %2378 = vmatpush3.msra.mxu1 %v1051_v53 }
 0x724   :  { %2379 = vmatprep.subr.mxu1 %v1050_v54 }
 0x725   :  { %2380 = vmatpush3.msra.mxu1 %v1050_v54 }
 0x726   :  { %2381 = vmatprep.subr.mxu1 %v1049_v55 }
 0x727   :  { %2382 = vmatpush3.msra.mxu1 %v1049_v55 }
 0x7c8   :  { %v2315_v47 = vpop.f32.mrf.mxu1 }
 0x7c9   :  { %v949_v50 = vadd.f32 %v2315_v47, %v876_v46  ;;  %v1319_v47 = vld [vmem:[%s3411_s2 + $0xa10] sm:$0xff] }
 0x7ca   :  { %v943_v48 = vpop.f32.mrf.mxu1 }
 0x7cb   :  { %v944_v49 = vadd.f32 %v943_v48, %v876_v46  ;;  %v1320_v46 = vld [vmem:[%s3411_s2 + $0xa20] sm:$0xff] }
 0x7cc   :  { %v1318_v48 = vld [vmem:[%s3411_s2 + $0xa00] sm:$0xff] }
 0x7cd   :  { %2348 = vmatprep.mubr.f32.mxu0 %v944_v49  ;;  %v3183_v49 = vld [vmem:[%s3412_s3 + $0x10] sm:$0xf] }
 0x7ce   :  { %2349 = vmatmul.mubr.f32.vlgmr.msra.gmra.mxu0 %v949_v50  ;;  %v1240_v50 = vrot.slane %v3183_v49, %v2736_v11  ;;  %v1412_v11 = vrot.slane %v3183_v49, %v337_v51  ;;  %v1519_v51 = vld [vmem:[%s3411_s2 + $0xbe8] sm:$0xff] }
 0x7cf   :  { %2387 = vmatpush3.msra.mxu0 %v1161_v57 }
 0x7d0   :  { %2388 = vmatprep.subr.mxu0 %v1160_v58 }
 0x7d1   :  { %2389 = vmatpush3.msra.mxu0 %v1160_v58 }
 0x7d2   :  { %2390 = vmatprep.subr.mxu0 %v1159_v59 }
 0x7d3   :  { %2391 = vmatpush3.msra.mxu0 %v1159_v59 }
 0x7d4   :  { %2392 = vmatprep.subr.mxu0 %v1158_v60 }
 0x7d5   :  { %2393 = vmatpush3.msra.mxu0 %v1158_v60 }
 0x7d6   :  { %2394 = vmatprep.subr.mxu0 %v1157_v61 }
 0x7d7   :  { %2395 = vmatpush3.msra.mxu0 %v1157_v61 }
 0x7d8   :  { %2396 = vmatprep.subr.mxu0 %v1156_v62 }
 0x7d9   :  { %2397 = vmatpush3.msra.mxu0 %v1156_v62 }
 0x7da   :  { %2398 = vmatprep.subr.mxu0 %v1155_v2 }
 0x7db   :  { %2399 = vmatpush3.msra.mxu0 %v1155_v2 }
 0x7dc   :  { %2400 = vmatprep.subr.mxu0 %v1154_v63 }
 0x7dd   :  { %2401 = vmatpush3.msra.mxu0 %v1154_v63 }
 0x7de   :  { %2402 = vmatprep.subr.mxu0 %v1153_v0 }
 0x7df   :  { %2403 = vmatpush3.msra.mxu0 %v1153_v0 }
 0x7e0   :  { %2404 = vmatprep.subr.mxu0 %v1152_v1 }
 0x7e1   :  { %2405 = vmatpush3.msra.mxu0 %v1152_v1 }
 0x7e2   :  { %2406 = vmatprep.subr.mxu0 %v1151_v3 }
 0x7e3   :  { %2407 = vmatpush3.msra.mxu0 %v1151_v3  ;;  %v1521_v3 = vld [vmem:[%s3411_s2 + $0xbf8] sm:$0xff] }
 0x7e4   :  { %2408 = vmatprep.subr.mxu0 %v1150_v4 }
 0x7e5   :  { %2409 = vmatpush3.msra.mxu0 %v1150_v4  ;;  %v1520_v4 = vld [vmem:[%s3411_s2 + $0xbf0] sm:$0xff] }
 0x7e6   :  { %2410 = vmatprep.subr.mxu0 %v1149_v19 }
 0x7e7   :  { %2411 = vmatpush3.msra.mxu0 %v1149_v19  ;;  %v1510_v19 = vld [vmem:[%s3411_s2 + $0xba0] sm:$0xff] }
 0x7e8   :  { %2412 = vmatprep.subr.mxu0 %v1148_v20 }
 0x7e9   :  { %2413 = vmatpush3.msra.mxu0 %v1148_v20  ;;  %v1509_v20 = vld [vmem:[%s3411_s2 + $0xb98] sm:$0xff] }
 0x7ea   :  { %2414 = vmatprep.subr.mxu0 %v1147_v21 }
 0x7eb   :  { %2415 = vmatpush3.msra.mxu0 %v1147_v21  ;;  %v1508_v21 = vld [vmem:[%s3411_s2 + $0xb90] sm:$0xff] }
 0x7ec   :  { %2416 = vmatprep.subr.mxu0 %v1146_v22 }
 0x7ed   :  { %2417 = vmatpush3.msra.mxu0 %v1146_v22  ;;  %v1507_v22 = vld [vmem:[%s3411_s2 + $0xb88] sm:$0xff] }
 0x88e   :  { %v2350_v8 = vpop.f32.mrf.mxu0 }
 0x88f   :  { %v1044_v9 = vadd.f32 %v2350_v8, %v971_v7  ;;  %v1516_v8 = vld [vmem:[%s3411_s2 + $0xbd0] sm:$0xff] }
 0x890   :  { %v1038_v13 = vpop.f32.mrf.mxu0 }
 0x891   :  { %v1039_v14 = vadd.f32 %v1038_v13, %v971_v7  ;;  %v1048_v16 = vmax.f32 %v1044_v9, 0.0  ;;  %v1517_v7 = vld [vmem:[%s3411_s2 + $0xbd8] sm:$0xff]  ;;  %v1515_v9 = vld [vmem:[%s3411_s2 + $0xbc8] sm:$0xff]  ;;  %v1514_v13 = vld [vmem:[%s3411_s2 + $0xbc0] sm:$0xff] }
 0x893   :  { %v1047_v15 = vmax.f32 %v1039_v14, 0.0  ;;  %v1513_v14 = vld [vmem:[%s3411_s2 + $0xbb8] sm:$0xff] }
 0x895   :  { %2383 = vmatprep.mubr.f32.mxu1 %v1047_v15  ;;  %v1512_v15 = vld [vmem:[%s3411_s2 + $0xbb0] sm:$0xff] }
 0x896   :  { %2384 = vmatmul.mubr.f32.vlgmr.msra.gmra.mxu1 %v1048_v16  ;;  %v1511_v16 = vld [vmem:[%s3411_s2 + $0xba8] sm:$0xff] }
 0x897   :  { %2425 = vmatprep.mubr.msk.f32.mxu1 %vm57_vm0, %v3105_v18 }
 0x956   :  { %v2385_v25 = vpop.f32.mrf.mxu1 }
 0x957   :  { %v1141_v26 = vadd.f32 %v2385_v25, %v1068_v24  ;;  %v1504_v25 = vld [vmem:[%s3411_s2 + $0xb70] sm:$0xff] }
 0x958   :  { %v1135_v27 = vpop.f32.mrf.mxu1 }
 0x959   :  { %v1136_v28 = vadd.f32 %v1135_v27, %v1068_v24  ;;  %v1145_v30 = vmax.f32 %v1141_v26, 0.0  ;;  %v1505_v24 = vld [vmem:[%s3411_s2 + $0xb78] sm:$0xff]  ;;  %v1503_v26 = vld [vmem:[%s3411_s2 + $0xb68] sm:$0xff]  ;;  %v1502_v27 = vld [vmem:[%s3411_s2 + $0xb60] sm:$0xff] }
 0x95b   :  { %v1144_v29 = vmax.f32 %v1136_v28, 0.0  ;;  %v1501_v28 = vld [vmem:[%s3411_s2 + $0xb58] sm:$0xff] }
 0x95d   :  { %2418 = vmatprep.mubr.f32.mxu0 %v1144_v29  ;;  %v1500_v29 = vld [vmem:[%s3411_s2 + $0xb50] sm:$0xff] }
 0x95e   :  { %2419 = vmatmul.mubr.f32.vlgmr.msra.gmra.mxu0 %v1145_v30  ;;  %v1499_v30 = vld [vmem:[%s3411_s2 + $0xb48] sm:$0xff] }
 0x95f   :  { %2467 = vmatprep.mubr.msk.f32.mxu0 %vm57_vm0, %v3105_v18 }
 0xa1e   :  { %v2420_v31 = vpop.f32.mrf.mxu0 }
 0xa1f   :  { %2421 = vmatprep.subr.mxu1 %v2420_v31 }
 0xa20   :  { %v1228_v5 = vpop.f32.mrf.mxu0  ;;  %2422 = vmatpush3.msra.mxu1 %v2420_v31  ;;  %v1498_v31 = vld [vmem:[%s3411_s2 + $0xb40] sm:$0xff] }
 0xa21   :  { %2423 = vmatprep.subr.mxu1 %v1228_v5 }
 0xa22   :  { %2424 = vmatpush3.msra.mxu1 %v1228_v5  ;;  %v1497_v5 = vld [vmem:[%s3411_s2 + $0xb38] sm:$0xff] }
 0xa23   :  { %2426 = vmatmul.mubr.msk.f32.vlgmr.msra.gmra.mxu1 %vm57_vm0, %v3134_v33  ;;  %2428 = vmatprep.subr.mxu1 %v1333_v32 }
 0xa24   :  { %2429 = vmatpush3.msra.mxu1 %v1333_v32  ;;  %v1496_v32 = vld [vmem:[%s3411_s2 + $0xb30] sm:$0xff] }
 0xa25   :  { %2430 = vmatprep.subr.mxu1 %v1332_v12 }
 0xa26   :  { %2431 = vmatpush3.msra.mxu1 %v1332_v12  ;;  %v1495_v12 = vld [vmem:[%s3411_s2 + $0xb28] sm:$0xff] }
 0xa27   :  { %2432 = vmatprep.subr.mxu1 %v1331_v34 }
 0xa28   :  { %2433 = vmatpush3.msra.mxu1 %v1331_v34  ;;  %v1494_v34 = vld [vmem:[%s3411_s2 + $0xb20] sm:$0xff] }
 0xa29   :  { %2434 = vmatprep.subr.mxu1 %v1330_v35 }
 0xa2a   :  { %2435 = vmatpush3.msra.mxu1 %v1330_v35  ;;  %v1493_v35 = vld [vmem:[%s3411_s2 + $0xb18] sm:$0xff] }
 0xa2b   :  { %2436 = vmatprep.subr.mxu1 %v1329_v37 }
 0xa2c   :  { %2437 = vmatpush3.msra.mxu1 %v1329_v37  ;;  %v1492_v37 = vld [vmem:[%s3411_s2 + $0xb10] sm:$0xff] }
 0xa2d   :  { %2438 = vmatprep.subr.mxu1 %v1328_v38 }
 0xa2e   :  { %2439 = vmatpush3.msra.mxu1 %v1328_v38  ;;  %v1491_v38 = vld [vmem:[%s3411_s2 + $0xb08] sm:$0xff] }
 0xa2f   :  { %2440 = vmatprep.subr.mxu1 %v1327_v39 }
 0xa30   :  { %2441 = vmatpush3.msra.mxu1 %v1327_v39  ;;  %v1490_v39 = vld [vmem:[%s3411_s2 + $0xb00] sm:$0xff] }
 0xa31   :  { %2442 = vmatprep.subr.mxu1 %v1326_v40 }
 0xa32   :  { %2443 = vmatpush3.msra.mxu1 %v1326_v40  ;;  %v1717_v40 = vld [vmem:[%s3411_s2 + $0xdf0] sm:$0xff] }
 0xa33   :  { %2444 = vmatprep.subr.mxu1 %v1325_v41 }
 0xa34   :  { %2445 = vmatpush3.msra.mxu1 %v1325_v41  ;;  %v1701_v41 = vld [vmem:[%s3411_s2 + $0xcf0] sm:$0xff] }
 0xa35   :  { %2446 = vmatprep.subr.mxu1 %v1324_v42 }
 0xa36   :  { %2447 = vmatpush3.msra.mxu1 %v1324_v42  ;;  %v1716_v42 = vld [vmem:[%s3411_s2 + $0xde0] sm:$0xff] }
 0xa37   :  { %2448 = vmatprep.subr.mxu1 %v1323_v43 }
 0xa38   :  { %2449 = vmatpush3.msra.mxu1 %v1323_v43  ;;  %v1700_v43 = vld [vmem:[%s3411_s2 + $0xce0] sm:$0xff] }
 0xa39   :  { %2450 = vmatprep.subr.mxu1 %v1322_v44 }
 0xa3a   :  { %2451 = vmatpush3.msra.mxu1 %v1322_v44  ;;  %v1715_v44 = vld [vmem:[%s3411_s2 + $0xdd0] sm:$0xff] }
 0xa3b   :  { %2452 = vmatprep.subr.mxu1 %v1321_v45 }
 0xa3c   :  { %2453 = vmatpush3.msra.mxu1 %v1321_v45  ;;  %v1699_v45 = vld [vmem:[%s3411_s2 + $0xcd0] sm:$0xff] }
 0xa3d   :  { %2454 = vmatprep.subr.mxu1 %v1320_v46 }
 0xa3e   :  { %2455 = vmatpush3.msra.mxu1 %v1320_v46  ;;  %v1714_v46 = vld [vmem:[%s3411_s2 + $0xdc0] sm:$0xff] }
 0xa3f   :  { %2456 = vmatprep.subr.mxu1 %v1319_v47 }
 0xa40   :  { %2457 = vmatpush3.msra.mxu1 %v1319_v47  ;;  %v1698_v47 = vld [vmem:[%s3411_s2 + $0xcc0] sm:$0xff] }
 0xa41   :  { %2458 = vmatprep.subr.mxu1 %v1318_v48 }
 0xa42   :  { %2459 = vmatpush3.msra.mxu1 %v1318_v48  ;;  %v1713_v48 = vld [vmem:[%s3411_s2 + $0xdb0] sm:$0xff] }
 0xa43   :  { %2106 = vmatprep.subr.mxu1 %v1717_v40 }
 0xae3   :  { %v2427_v52 = vpop.f32.mrf.mxu1 }
 0xae4   :  { %v1313_v53 = vadd.f32 %v2427_v52, %v1240_v50  ;;  %v1712_v52 = vld [vmem:[%s3411_s2 + $0xda0] sm:$0xff] }
 0xae5   :  { %v1307_v54 = vpop.f32.mrf.mxu1 }
 0xae6   :  { %v1308_v55 = vadd.f32 %v1307_v54, %v1240_v50  ;;  %v1317_v58 = vmax.f32 %v1313_v53, 0.0  ;;  %v1697_v50 = vld [vmem:[%s3411_s2 + $0xcb0] sm:$0xff]  ;;  %v1696_v53 = vld [vmem:[%s3411_s2 + $0xca0] sm:$0xff] }
 0xae7   :  { %v1711_v54 = vld [vmem:[%s3411_s2 + $0xd90] sm:$0xff] }
 0xae8   :  { %v1316_v57 = vmax.f32 %v1308_v55, 0.0  ;;  %v1695_v55 = vld [vmem:[%s3411_s2 + $0xc90] sm:$0xff] }
 0xaea   :  { %2460 = vmatprep.mubr.f32.mxu1 %v1316_v57  ;;  %v1710_v57 = vld [vmem:[%s3411_s2 + $0xd80] sm:$0xff] }
 0xaeb   :  { %2461 = vmatmul.mubr.f32.vlgmr.msra.gmra.mxu1 %v1317_v58  ;;  %v1694_v58 = vld [vmem:[%s3411_s2 + $0xc80] sm:$0xff] }
 0xaec   :  { %2107 = vmatpush3.msra.mxu1 %v1701_v41 }
 0xaed   :  { %2108 = vmatprep.subr.mxu1 %v1716_v42 }
 0xaee   :  { %2109 = vmatpush3.msra.mxu1 %v1700_v43 }
 0xaef   :  { %2110 = vmatprep.subr.mxu1 %v1715_v44 }
 0xaf0   :  { %2111 = vmatpush3.msra.mxu1 %v1699_v45 }
 0xaf1   :  { %2112 = vmatprep.subr.mxu1 %v1714_v46 }
 0xaf2   :  { %2113 = vmatpush3.msra.mxu1 %v1698_v47 }
 0xaf3   :  { %2114 = vmatprep.subr.mxu1 %v1713_v48 }
 0xaf4   :  { %2115 = vmatpush3.msra.mxu1 %v1697_v50 }
 0xaf5   :  { %2116 = vmatprep.subr.mxu1 %v1712_v52 }
 0xaf6   :  { %2117 = vmatpush3.msra.mxu1 %v1696_v53 }
 0xaf7   :  { %2118 = vmatprep.subr.mxu1 %v1711_v54 }
 0xaf8   :  { %2119 = vmatpush3.msra.mxu1 %v1695_v55 }
 0xaf9   :  { %2120 = vmatprep.subr.mxu1 %v1710_v57 }
 0xafa   :  { %2121 = vmatpush3.msra.mxu1 %v1694_v58 }
 0xbab   :  { %v2462_v59 = vpop.f32.mrf.mxu1 }
 0xbac   :  { %2463 = vmatprep.subr.mxu0 %v2462_v59 }
 0xbad   :  { %v1400_v60 = vpop.f32.mrf.mxu1  ;;  %2464 = vmatpush3.msra.mxu0 %v2462_v59  ;;  %v1709_v59 = vld [vmem:[%s3411_s2 + $0xd70] sm:$0xff] }
 0xbae   :  { %2465 = vmatprep.subr.mxu0 %v1400_v60  ;;  %2122 = vmatprep.subr.mxu1 %v1709_v59 }
 0xbaf   :  { %2466 = vmatpush3.msra.mxu0 %v1400_v60  ;;  %v1693_v60 = vld [vmem:[%s3411_s2 + $0xc70] sm:$0xff] }
 0xbb0   :  { %2468 = vmatmul.mubr.msk.f32.vlgmr.msra.gmra.mxu0 %vm57_vm0, %v3134_v33  ;;  %2123 = vmatpush3.msra.mxu1 %v1693_v60 }
 0xbb1   :  { %2474 = vmatprep.mubr.msk.f32.mxu0 %vm57_vm0, %v3105_v18 }
 0xc70   :  { %v2469_v61 = vpop.f32.mrf.mxu0 }
 0xc71   :  { %v1485_v62 = vadd.f32 %v2469_v61, %v1412_v11  ;;  %v1692_v61 = vld [vmem:[%s3411_s2 + $0xc60] sm:$0xff] }
 0xc72   :  { %v1479_v2 = vpop.f32.mrf.mxu0 }
 0xc73   :  { %v1489_v63 = vmax.f32 %v1485_v62, 0.0  ;;  %v1480_v0 = vadd.f32 %v1479_v2, %v1412_v11  ;;  %v1708_v11 = vld [vmem:[%s3411_s2 + $0xd60] sm:$0xff]  ;;  %v1707_v62 = vld [vmem:[%s3411_s2 + $0xd50] sm:$0xff] }
 0xc74   :  { %2124 = vmatprep.subr.mxu1 %v1708_v11  ;;  %v1691_v2 = vld [vmem:[%s3411_s2 + $0xc50] sm:$0xff] }
 0xc75   :  { %v1488_v1 = vmax.f32 %v1480_v0, 0.0  ;;  %2470 = vmatprep.subr.mxu0 %v1489_v63  ;;  %2125 = vmatpush3.msra.mxu1 %v1692_v61  ;;  %v1690_v0 = vld [vmem:[%s3411_s2 + $0xc40] sm:$0xff] }
 0xc76   :  { %2471 = vmatpush3.msra.mxu0 %v1489_v63  ;;  %v1706_v63 = vld [vmem:[%s3411_s2 + $0xd40] sm:$0xff]  ;;  %2126 = vmatprep.subr.mxu1 %v1707_v62 }
 0xc77   :  { %2472 = vmatprep.subr.mxu0 %v1488_v1  ;;  %2127 = vmatpush3.msra.mxu1 %v1691_v2 }
 0xc78   :  { %2473 = vmatpush3.msra.mxu0 %v1488_v1  ;;  %2128 = vmatprep.subr.mxu1 %v1706_v63 }
 0xc79   :  { %2475 = vmatmul.mubr.msk.f32.vlgmr.msra.gmra.mxu0 %vm57_vm0, %v3134_v33  ;;  %1605 = vmatprep.subr.mxu0 %v1521_v3 }
 0xc7a   :  { %1606 = vmatpush1.msra.mxu0 %v1520_v4  ;;  %1669 = vmatprep.mubr.f32.mxu0 %v2491_v36  ;;  %v1705_v4 = vld [vmem:[%s3411_s2 + $0xd30] sm:$0xff] }
 0xc7b   :  { %1607 = vmatprep.subr.mxu0 %v1519_v51  ;;  %2129 = vmatpush3.msra.mxu1 %v1690_v0  ;;  %v1689_v51 = vld [vmem:[%s3411_s2 + $0xc30] sm:$0xff] }
 0xc7c   :  { %1608 = vmatpush1.msra.mxu0 %v1518_v6  ;;  %2130 = vmatprep.subr.mxu1 %v1705_v4  ;;  %v1704_v6 = vld [vmem:[%s3411_s2 + $0xd20] sm:$0xff] }
 0xc7d   :  { %1609 = vmatprep.subr.mxu0 %v1517_v7  ;;  %2131 = vmatpush3.msra.mxu1 %v1689_v51  ;;  %v1687_v7 = vld [vmem:[%s3411_s2 + $0xc10] sm:$0xff] }
 0xc7e   :  { %1610 = vmatpush1.msra.mxu0 %v1516_v8  ;;  %2132 = vmatprep.subr.mxu1 %v1704_v6  ;;  %v1702_v8 = vld [vmem:[%s3411_s2 + $0xd00] sm:$0xff] }
 0xc7f   :  { %1611 = vmatprep.subr.mxu0 %v1515_v9  ;;  %v1686_v9 = vld [vmem:[%s3411_s2 + $0xc00] sm:$0xff] }
 0xc80   :  { %1612 = vmatpush1.msra.mxu0 %v1514_v13  ;;  %v24_v13 = vld [vmem:[%s3412_s3 + $0x18] sm:$0xf] }
 0xc81   :  { %1613 = vmatprep.subr.mxu0 %v1513_v14  ;;  %v1600_v14 = vrot.slane %v3183_v49, %v2858_v17 }
 0xc82   :  { %1614 = vmatpush1.msra.mxu0 %v1512_v15  ;;  %v1604_v15 = vrot.slane %v24_v13, %v2858_v17 }
 0xc83   :  { %1615 = vmatprep.subr.mxu0 %v1511_v16 }
 0xc84   :  { %1616 = vmatpush1.msra.mxu0 %v1510_v19 }
 0xc85   :  { %1617 = vmatprep.subr.mxu0 %v1509_v20 }
 0xc86   :  { %1618 = vmatpush1.msra.mxu0 %v1508_v21 }
 0xc87   :  { %1619 = vmatprep.subr.mxu0 %v1507_v22 }
 0xc88   :  { %1620 = vmatpush1.msra.mxu0 %v1506_v23 }
 0xc89   :  { %1621 = vmatprep.subr.mxu0 %v1505_v24 }
 0xc8a   :  { %1622 = vmatpush1.msra.mxu0 %v1504_v25 }
 0xc8b   :  { %1623 = vmatprep.subr.mxu0 %v1503_v26 }
 0xc8c   :  { %1624 = vmatpush1.msra.mxu0 %v1502_v27 }
 0xc8d   :  { %1625 = vmatprep.subr.mxu0 %v1501_v28 }
 0xc8e   :  { %1626 = vmatpush1.msra.mxu0 %v1500_v29 }
 0xc8f   :  { %1627 = vmatprep.subr.mxu0 %v1499_v30 }
 0xc90   :  { %1628 = vmatpush1.msra.mxu0 %v1498_v31 }
 0xc91   :  { %1629 = vmatprep.subr.mxu0 %v1497_v5 }
 0xc92   :  { %1630 = vmatpush1.msra.mxu0 %v1496_v32 }
 0xc93   :  { %1631 = vmatprep.subr.mxu0 %v1495_v12 }
 0xc94   :  { %1632 = vmatpush1.msra.mxu0 %v1494_v34  ;;  %v1796_v34 = vrot.slane %v3183_v49, %v681_v56 }
 0xc95   :  { %1633 = vmatprep.subr.mxu0 %v1493_v35 }
 0xc96   :  { %1634 = vmatpush1.msra.mxu0 %v1492_v37 }
 0xc97   :  { %1635 = vmatprep.subr.mxu0 %v1491_v38 }
 0xc98   :  { %1636 = vmatpush1.msra.mxu0 %v1490_v39 }
 0xd39   :  { %v2476_v1 = vpop.f32.mrf.mxu0 }
 0xd3b   :  { %v1588_v3 = vpop.f32.mrf.mxu0 }
 0xd3c   :  { %1670 = vmatmul.mubr.f32.vlgmr.msra.gmra.mxu0 %v1588_v3 }
 0xd3d   :  { %1675 = vmatprep.mubr.f32.mxu0 %v2491_v36  ;;  %v1688_v36 = vld [vmem:[%s3411_s2 + $0xc20] sm:$0xff] }
 0xd3e   :  { %2133 = vmatpush3.msra.mxu1 %v1688_v36 }
 0xd40   :  { %1676 = vmatmul.mubr.f32.gmra.mxu0 %v2476_v1 }
 0xd41   :  { %2481 = vmatprep.mubr.msk.f32.mxu0 %vm57_vm0, %v3105_v18  ;;  %v1703_v18 = vld [vmem:[%s3411_s2 + $0xd10] sm:$0xff] }
 0xd42   :  { %2134 = vmatprep.subr.mxu1 %v1703_v18 }
 0xd43   :  { %2135 = vmatpush3.msra.mxu1 %v1687_v7 }
 0xd44   :  { %2136 = vmatprep.subr.mxu1 %v1702_v8 }
 0xd45   :  { %2137 = vmatpush3.msra.mxu1 %v1686_v9 }
 0xdfc   :  { %v1671_v16 = vpop.f32.mrf.mxu0 }
 0xdfd   :  { %v1672_v19 = vadd.f32 %v1671_v16, %v1600_v14 }
 0xdfe   :  { %v1673_v20 = vpop.f32.mrf.mxu0 }
 0xdff   :  { %v1674_v21 = vadd.f32 %v1673_v20, %v1604_v15  ;;  %v1682_v24 = vmax.f32 %v1672_v19, 0.0 }
 0xe00   :  { %v1677_v22 = vpop.f32.mrf.mxu0 }
 0xe01   :  { %v1683_v23 = vmax.f32 %v1674_v21, 0.0  ;;  %v1678_v25 = vadd.f32 %v1677_v22, %v1600_v14 }
 0xe02   :  { %v1679_v26 = vpop.f32.mrf.mxu0 }
 0xe03   :  { %v1680_v27 = vadd.f32 %v1679_v26, %v1604_v15  ;;  %1782 = vmatprep.mubr.f32.mxu1 %v1683_v23  ;;  %v1684_v29 = vmax.f32 %v1678_v25, 0.0 }
 0xe04   :  { %1783 = vmatmul.mubr.f32.vlgmr.msra.gmra.mxu1 %v1682_v24 }
 0xe05   :  { %v1685_v28 = vmax.f32 %v1680_v27, 0.0 }
 0xe07   :  { %1787 = vmatprep.mubr.f32.mxu1 %v1685_v28 }
 0xe08   :  { %1788 = vmatmul.mubr.f32.gmra.mxu1 %v1684_v29 }
 0xec4   :  { %v2138_v30 = vpop.f32.mrf.mxu1 }
 0xec6   :  { %v2139_v31 = vpop.f32.mrf.mxu1 }
 0xec7   :  { %v2140_v12 = vadd.f32 %v2139_v31, %v2138_v30 }
 0xec8   :  { %v2141_v5 = vpop.f32.mrf.mxu1 }
 0xeca   :  { %v2142_v17 = vpop.f32.mrf.mxu1 }
 0xecb   :  { %v2143_v32 = vadd.f32 %v2142_v17, %v2141_v5 }
 0xecd   :  { %2477 = vmatprep.subr.mxu0 %v2143_v32 }
 0xece   :  { %2478 = vmatpush3.msra.mxu0 %v2143_v32 }
 0xecf   :  { %2479 = vmatprep.subr.mxu0 %v2140_v12 }
 0xed0   :  { %2480 = vmatpush3.msra.mxu0 %v2140_v12 }
 0xed1   :  { %2482 = vmatmul.mubr.msk.f32.vlgmr.msra.gmra.mxu0 %vm57_vm0, %v3134_v33 }
 0xf91   :  { %v2483_v35 = vpop.f32.mrf.mxu0 }
 0xf92   :  { %v1869_v37 = vadd.f32 %v2483_v35, %v1796_v34 }
 0xf93   :  { %v1863_v38 = vpop.f32.mrf.mxu0 }
 0xf94   :  { %2485 = vtanh.f32 %v1869_v37  ;;  %v1864_v39 = vadd.f32 %v1863_v38, %v1796_v34 }
 0xf96   :  { %2487 = vtanh.f32 %v1864_v39 }
 0xfa1   :  { %v2486_v40 = vpop.eup %2485 }
 0xfa2   :  { %1875 = vst [vmem:[%s3413_s4 + $0x8] sm:$0xff] %v2486_v40 }
 0xfa3   :  { %v2488_v41 = vpop.eup %2487 }
 0xfa4   :  { %1874 = vst [vmem:[%s3413_s4] sm:$0xff] %v2488_v41 }

</bundles_post_ra>
